<compile_context>
chip_gen: v6e
topology: v6e:2x2x1
jax: 0.10.0
libtpu: 0.0.40
codegen_flags: <defaults>
</compile_context>

<pallas_src>
import functools

import jax
import jax.numpy as jnp
from jax.experimental import pallas as pl
from jax.experimental.pallas import tpu as pltpu

POOL_H, POOL_W = 4, 12   # pool_kernel=(4, 12) as in the PyTorch module


def _window_shifts(pw):
    """Log-tree shift schedule covering a pw-wide window (12 -> [1, 2, 4, 4])."""
    shifts, cov = [], 1
    while cov < pw:
        s = min(cov, pw - cov)
        shifts.append(s)
        cov += s
    return shifts


def _fcam_kernel(x_ref, p_ref, e_ref,
                 wa1_ref, ba1_ref, wa2_ref, ba2_ref,
                 wm1_ref, bm1_ref, wm2_ref, bm2_ref,
                 o_ref, *, nb, c, wc, hp, ph, pw):
    """One grid step = one batch block of `nb` images.

    x_ref : (nb*C, Hc*Wc)  rows = (image, channel), lanes = flattened (h, w)
    p_ref : (Hc*Wc, S)     0/1 window-membership matrix (avg pool via MXU)
    e_ref : (Hp*Wc, S)     0/1 window-start selection matrix (max extraction)
    w*/b* : 1x1-conv weights / column-vector biases (avg & max branches)
    o_ref : (C, nb*S)      lane-dense, channel-major output block
    """
    f32 = jnp.float32
    inv_win = 1.0 / float(ph * pw)

    # ---- average pool: one MXU matmul (window sums), scaled on the VPU -----
    avg = jnp.dot(x_ref[...], p_ref[...], preferred_element_type=f32) * inv_win

    # ---- max pool -----------------------------------------------------------
    shifts = _window_shifts(pw)
    pieces = []
    for ih in range(hp):
        base = ih * ph * wc
        # max over the ph spatial rows of this pooled row (contiguous slices)
        r = x_ref[:, base:base + wc]
        for rr in range(1, ph):
            r = jnp.maximum(r, x_ref[:, base + rr * wc: base + (rr + 1) * wc])
        # log-tree over the pw-wide window: afterwards lane j holds
        # max(r[j : j + pw]), so each window's max sits on its first lane.
        for k in shifts:
            r = jnp.maximum(r, jnp.concatenate([r[:, k:], r[:, :k]], axis=1))
        pieces.append(r)
    rcat = pieces[0] if hp == 1 else jnp.concatenate(pieces, axis=1)
    mx = jnp.dot(rcat, e_ref[...], preferred_element_type=f32)      # (nb*C, S)

    # ---- rearrange (nb*C, S) -> (C, nb*S): channel mixing = 4 fused matmuls -
    def to_cmajor(p):
        if nb == 1:
            return p
        return jnp.concatenate([p[n * c:(n + 1) * c, :] for n in range(nb)],
                               axis=1)

    at = to_cmajor(avg)                                             # (C, nb*S)
    mt = to_cmajor(mx)

    # ---- per-branch 1x1 conv -> ReLU -> 1x1 conv, sum, sigmoid --------------
    ha = jnp.maximum(
        jnp.dot(wa1_ref[...], at, preferred_element_type=f32) + ba1_ref[...],
        0.0)
    ya = jnp.dot(wa2_ref[...], ha, preferred_element_type=f32) + ba2_ref[...]
    hm = jnp.maximum(
        jnp.dot(wm1_ref[...], mt, preferred_element_type=f32) + bm1_ref[...],
        0.0)
    ym = jnp.dot(wm2_ref[...], hm, preferred_element_type=f32) + bm2_ref[...]
    o_ref[...] = jax.nn.sigmoid(ya + ym).astype(o_ref.dtype)


def _vmem_limit_bytes():
    """Chip-aware scoped-VMEM limit (v5e/v6e: 128 MiB, v7x: 64 MiB per core)."""
    try:
        cap = int(pltpu.get_tpu_info().vmem_capacity_bytes)
    except Exception:
        cap = 64 << 20
    return max(16 << 20, min(96 << 20, (3 * cap) // 4))


def _pick_batch_block(n, c, plane_elems, itemsize, block_budget, requested=None):
    """Largest divisor of n whose input block fits the budget; prefers
    n // nb >= 2 so the 'parallel' axis can shard across TensorCores, and
    caps nb so the in-kernel pooled-plane rearrangement stays small."""
    if requested is not None:
        assert n % requested == 0, "batch_block must divide the batch size"
        return requested
    divisors = [d for d in range(1, n + 1) if n % d == 0 and d <= 64]
    per_img = c * plane_elems * itemsize
    fitting = [d for d in divisors if d * per_img <= block_budget]
    if not fitting:
        # TODO(synk): split along channels / spatial when a single image
        # exceeds the VMEM budget instead of relying on nb=1 still lowering.
        return 1
    pref = [d for d in fitting if n // d >= 2]
    return max(pref) if pref else max(fitting)


def fcam_forward(x, wa1, ba1, wa2, ba2, wm1, bm1, wm2, bm2, *, batch_block=None):
    """Pallas-TPU FCAM.forward.

    x: (N, C, H, W); wa1/wm1: (Co, C[,1,1]); wa2/wm2: (C, Co[,1,1]);
    biases: (Co,) / (C,).  Returns (N, C, H//4, W//12)."""
    N, C, H, W = x.shape
    ph, pw = POOL_H, POOL_W
    Hp, Wp = H // ph, W // pw
    assert Hp >= 1 and Wp >= 1, "input smaller than the pooling kernel"
    Hc, Wc = Hp * ph, Wp * pw
    S = Hp * Wp
    Co = wa1.shape[0]
    out_dtype = x.dtype

    # PyTorch pooling (ceil_mode=False) drops remainder rows/cols.
    xc = x if (Hc == H and Wc == W) else x[:, :, :Hc, :Wc]

    vmem_limit = _vmem_limit_bytes()
    nb = _pick_batch_block(N, C, Hc * Wc, jnp.dtype(x.dtype).itemsize,
                           vmem_limit // 5, batch_block)
    G = N // nb
    # Lane-dense, batch-blocked view (free reshape of contiguous NCHW).
    x3 = xc.reshape(G, nb * C, Hc * Wc)

    # 0/1 pooling matrices, in the activation dtype (they feed the MXU).
    lane = jnp.arange(Hc * Wc)
    tgt = (lane // Wc // ph) * Wp + (lane % Wc) // pw
    pmat = (tgt[:, None] == jnp.arange(S)[None, :]).astype(x.dtype)

    lane_e = jnp.arange(Hp * Wc)
    tgt_e = (lane_e // Wc) * Wp + (lane_e % Wc) // pw
    start_e = (lane_e % Wc) % pw == 0
    emat = (start_e[:, None]
            & (tgt_e[:, None] == jnp.arange(S)[None, :])).astype(x.dtype)

    mat = lambda v: v.reshape(v.shape[0], -1).astype(jnp.float32)
    col = lambda v: v.reshape(-1, 1).astype(jnp.float32)
    full = lambda shape: pl.BlockSpec(shape, lambda i: (0, 0))

    kernel = functools.partial(_fcam_kernel, nb=nb, c=C, wc=Wc,
                               hp=Hp, ph=ph, pw=pw)

    flops = (2 * N * C * Hc * Wc * S          # avg pooling matmul
             + 2 * N * C * Hp * Wc * S        # max selection matmul
             + 2 * N * C * Hc * Wc            # max tree (VPU)
             + 8 * N * S * C * Co)            # 4 channel-mixing matmuls
    cost = pl.CostEstimate(
        flops=int(flops),
        transcendentals=int(N * C * S),
        bytes_accessed=int(x3.size * x3.dtype.itemsize
                           + N * C * S * jnp.dtype(out_dtype).itemsize
                           + (pmat.size + emat.size) * pmat.dtype.itemsize
                           + 4 * (C * Co + C + Co) * 4))

    out3 = pl.pallas_call(
        kernel,
        out_shape=jax.ShapeDtypeStruct((G, C, nb * S), out_dtype),
        grid_spec=pltpu.PrefetchScalarGridSpec(
            num_scalar_prefetch=0,
            grid=(G,),
            in_specs=[
                pl.BlockSpec((None, nb * C, Hc * Wc), lambda i: (i, 0, 0)),
                full((Hc * Wc, S)), full((Hp * Wc, S)),
                full((Co, C)), full((Co, 1)), full((C, Co)), full((C, 1)),
                full((Co, C)), full((Co, 1)), full((C, Co)), full((C, 1)),
            ],
            out_specs=pl.BlockSpec((None, C, nb * S), lambda i: (i, 0, 0)),
        ),
        compiler_params=pltpu.CompilerParams(
            dimension_semantics=("parallel",),
            vmem_limit_bytes=int(vmem_limit)),
        cost_estimate=cost,
    )(x3, pmat, emat,
      mat(wa1), col(ba1), mat(wa2), col(ba2),
      mat(wm1), col(bm1), mat(wm2), col(bm2))

    # Tiny channel-major -> NCHW un-permute of the pooled-size output.
    out = out3.reshape(G, C, nb, Hp, Wp).transpose(0, 2, 1, 3, 4)
    return out.reshape(N, C, Hp, Wp)


def fcam_reference(x, wa1, ba1, wa2, ba2, wm1, bm1, wm2, bm2):
    """Pure-JAX f32 reference of the PyTorch FCAM.forward (for verification)."""
    N, C, H, W = x.shape
    ph, pw = POOL_H, POOL_W
    Hp, Wp = H // ph, W // pw
    xc = x[:, :, :Hp * ph, :Wp * pw].astype(jnp.float32)
    xr = xc.reshape(N, C, Hp, ph, Wp, pw)
    avg = xr.mean(axis=(3, 5))
    mxp = xr.max(axis=(3, 5))
    hi = jax.lax.Precision.HIGHEST

    def branch(p, w1, b1, w2, b2):
        w1 = w1.reshape(w1.shape[0], -1).astype(jnp.float32)
        w2 = w2.reshape(w2.shape[0], -1).astype(jnp.float32)
        h = jnp.einsum('oc,nchw->nohw', w1, p, precision=hi) + b1.reshape(1, -1, 1, 1)
        h = jax.nn.relu(h)
        return jnp.einsum('co,nohw->nchw', w2, h, precision=hi) + b2.reshape(1, -1, 1, 1)

    y = branch(avg, wa1, ba1, wa2, ba2) + branch(mxp, wm1, bm1, wm2, bm2)
    return jax.nn.sigmoid(y).astype(x.dtype)


if __name__ == "__main__":
    def u(k, shape, fan_in):
        b = 1.0 / (fan_in ** 0.5)
        return jax.random.uniform(k, shape, jnp.float32, -b, b)

    def run_case(key, n, c, co, h, w, batch_block=None):
        kx, k1, k2, k3, k4, k5, k6, k7, k8 = jax.random.split(key, 9)
        x = jax.random.normal(kx, (n, c, h, w), dtype=jnp.float32)
        # Conv2d(C, Co, 1) / Conv2d(Co, C, 1) parameters per branch.
        wa1, ba1 = u(k1, (co, c), c), u(k2, (co,), c)
        wa2, ba2 = u(k3, (c, co), co), u(k4, (c,), co)
        wm1, bm1 = u(k5, (co, c), c), u(k6, (co,), c)
        wm2, bm2 = u(k7, (c, co), co), u(k8, (c,), co)

        out = fcam_forward(x, wa1, ba1, wa2, ba2, wm1, bm1, wm2, bm2,
                           batch_block=batch_block)
        out = jax.block_until_ready(out)
        ref = fcam_reference(x, wa1, ba1, wa2, ba2, wm1, bm1, wm2, bm2)

        assert out.shape == (n, c, h // POOL_H, w // POOL_W), out.shape
        err = float(jnp.max(jnp.abs(out.astype(jnp.float32)
                                    - ref.astype(jnp.float32))))
        # Kernel uses default MXU precision (bf16 passes) vs. an f32 HIGHEST
        # reference, so allow a small tolerance on the sigmoid-gated output.
        assert err < 2e-2, f"mismatch vs reference, max abs err = {err:.3e}"

    root = jax.random.PRNGKey(0)
    k_a, k_b = jax.random.split(root)
    # pool_kernel=(4, 12): spatial must cover at least one window.
    run_case(k_a, n=2, c=4, co=2, h=16, w=48)                   # nb=1, grid=(2,)
    run_case(k_b, n=4, c=8, co=4, h=10, w=26, batch_block=2)    # floor-crop, nb=2
    print("KERNEL_OK")
</pallas_src>

<mosaic_0001>
module attributes {stable_mosaic.version = 11 : i64} {
  func.func @_fcam_kernel(%arg0: i32, %arg1: memref<1x4x768xf32, #tpu.memory_space<vmem>>, %arg2: memref<768x16xf32, #tpu.memory_space<vmem>>, %arg3: memref<192x16xf32, #tpu.memory_space<vmem>>, %arg4: memref<2x4xf32, #tpu.memory_space<vmem>>, %arg5: memref<2x1xf32, #tpu.memory_space<vmem>>, %arg6: memref<4x2xf32, #tpu.memory_space<vmem>>, %arg7: memref<4x1xf32, #tpu.memory_space<vmem>>, %arg8: memref<2x4xf32, #tpu.memory_space<vmem>>, %arg9: memref<2x1xf32, #tpu.memory_space<vmem>>, %arg10: memref<4x2xf32, #tpu.memory_space<vmem>>, %arg11: memref<4x1xf32, #tpu.memory_space<vmem>>, %arg12: memref<1x4x16xf32, #tpu.memory_space<vmem>>) attributes {dimension_semantics = [#tpu.dimension_semantics<parallel>], iteration_bounds = array<i64: 2>, scalar_prefetch = 0 : i64, scratch_operands = 0 : i64, tpu.core_type = #tpu.core_type<tc>, window_params = [{transform_indices = @transform_0, window_bounds = array<i64: 1, 4, 768>}, {pipeline_mode = #tpu.pipeline_mode<synchronous>, transform_indices = @transform_1, window_bounds = array<i64: 768, 16>}, {pipeline_mode = #tpu.pipeline_mode<synchronous>, transform_indices = @transform_2, window_bounds = array<i64: 192, 16>}, {pipeline_mode = #tpu.pipeline_mode<synchronous>, transform_indices = @transform_3, window_bounds = array<i64: 2, 4>}, {pipeline_mode = #tpu.pipeline_mode<synchronous>, transform_indices = @transform_4, window_bounds = array<i64: 2, 1>}, {pipeline_mode = #tpu.pipeline_mode<synchronous>, transform_indices = @transform_5, window_bounds = array<i64: 4, 2>}, {pipeline_mode = #tpu.pipeline_mode<synchronous>, transform_indices = @transform_6, window_bounds = array<i64: 4, 1>}, {pipeline_mode = #tpu.pipeline_mode<synchronous>, transform_indices = @transform_7, window_bounds = array<i64: 2, 4>}, {pipeline_mode = #tpu.pipeline_mode<synchronous>, transform_indices = @transform_8, window_bounds = array<i64: 2, 1>}, {pipeline_mode = #tpu.pipeline_mode<synchronous>, transform_indices = @transform_9, window_bounds = array<i64: 4, 2>}, {pipeline_mode = #tpu.pipeline_mode<synchronous>, transform_indices = @transform_10, window_bounds = array<i64: 4, 1>}, {transform_indices = @transform_11, window_bounds = array<i64: 1, 4, 16>}]} {
    %c0 = arith.constant 0 : index
    %c0_0 = arith.constant 0 : index
    %c0_1 = arith.constant 0 : index
    %0 = vector.load %arg1[%c0, %c0_0, %c0_1] : memref<1x4x768xf32, #tpu.memory_space<vmem>>, vector<1x4x768xf32>
    %1 = vector.shape_cast %0 : vector<1x4x768xf32> to vector<4x768xf32>
    %c0_2 = arith.constant 0 : index
    %c0_3 = arith.constant 0 : index
    %2 = vector.load %arg2[%c0_2, %c0_3] : memref<768x16xf32, #tpu.memory_space<vmem>>, vector<768x16xf32>
    %cst = arith.constant dense<0.000000e+00> : vector<4x16xf32>
    %3 = tpu.matmul %1, %2, %cst {dimension_numbers = #tpu.dot_dimension_numbers<[1], [0], [0], [1], [0, 0, 1, 1], [], []>} : vector<4x768xf32>, vector<768x16xf32>, vector<4x16xf32> -> vector<4x16xf32>
    %cst_4 = arith.constant 0.020833334 : f32
    %4 = vector.broadcast %cst_4 : f32 to vector<4x16xf32>
    %5 = arith.mulf %3, %4 : vector<4x16xf32>
    %c0_5 = arith.constant 0 : index
    %c0_6 = arith.constant 0 : index
    %c0_7 = arith.constant 0 : index
    %6 = vector.load %arg1[%c0_5, %c0_6, %c0_7] : memref<1x4x768xf32, #tpu.memory_space<vmem>>, vector<1x4x48xf32>
    %7 = vector.shape_cast %6 : vector<1x4x48xf32> to vector<4x48xf32>
    %c0_8 = arith.constant 0 : index
    %c0_9 = arith.constant 0 : index
    %c48 = arith.constant 48 : index
    %8 = vector.load %arg1[%c0_8, %c0_9, %c48] : memref<1x4x768xf32, #tpu.memory_space<vmem>>, vector<1x4x48xf32>
    %9 = vector.shape_cast %8 : vector<1x4x48xf32> to vector<4x48xf32>
    %10 = arith.maximumf %7, %9 : vector<4x48xf32>
    %c0_10 = arith.constant 0 : index
    %c0_11 = arith.constant 0 : index
    %c96 = arith.constant 96 : index
    %11 = vector.load %arg1[%c0_10, %c0_11, %c96] : memref<1x4x768xf32, #tpu.memory_space<vmem>>, vector<1x4x48xf32>
    %12 = vector.shape_cast %11 : vector<1x4x48xf32> to vector<4x48xf32>
    %13 = arith.maximumf %10, %12 : vector<4x48xf32>
    %c0_12 = arith.constant 0 : index
    %c0_13 = arith.constant 0 : index
    %c144 = arith.constant 144 : index
    %14 = vector.load %arg1[%c0_12, %c0_13, %c144] : memref<1x4x768xf32, #tpu.memory_space<vmem>>, vector<1x4x48xf32>
    %15 = vector.shape_cast %14 : vector<1x4x48xf32> to vector<4x48xf32>
    %16 = arith.maximumf %13, %15 : vector<4x48xf32>
    %17 = vector.extract_strided_slice %16 {offsets = [0, 1], sizes = [4, 47], strides = [1, 1]} : vector<4x48xf32> to vector<4x47xf32>
    %18 = vector.extract_strided_slice %16 {offsets = [0, 0], sizes = [4, 1], strides = [1, 1]} : vector<4x48xf32> to vector<4x1xf32>
    %19 = tpu.concatenate %17, %18 in 1 : vector<4x47xf32>, vector<4x1xf32> -> vector<4x48xf32>
    %20 = arith.maximumf %16, %19 : vector<4x48xf32>
    %21 = vector.extract_strided_slice %20 {offsets = [0, 2], sizes = [4, 46], strides = [1, 1]} : vector<4x48xf32> to vector<4x46xf32>
    %22 = vector.extract_strided_slice %20 {offsets = [0, 0], sizes = [4, 2], strides = [1, 1]} : vector<4x48xf32> to vector<4x2xf32>
    %23 = tpu.concatenate %21, %22 in 1 : vector<4x46xf32>, vector<4x2xf32> -> vector<4x48xf32>
    %24 = arith.maximumf %20, %23 : vector<4x48xf32>
    %25 = vector.extract_strided_slice %24 {offsets = [0, 4], sizes = [4, 44], strides = [1, 1]} : vector<4x48xf32> to vector<4x44xf32>
    %26 = vector.extract_strided_slice %24 {offsets = [0, 0], sizes = [4, 4], strides = [1, 1]} : vector<4x48xf32> to vector<4x4xf32>
    %27 = tpu.concatenate %25, %26 in 1 : vector<4x44xf32>, vector<4x4xf32> -> vector<4x48xf32>
    %28 = arith.maximumf %24, %27 : vector<4x48xf32>
    %29 = vector.extract_strided_slice %28 {offsets = [0, 4], sizes = [4, 44], strides = [1, 1]} : vector<4x48xf32> to vector<4x44xf32>
    %30 = vector.extract_strided_slice %28 {offsets = [0, 0], sizes = [4, 4], strides = [1, 1]} : vector<4x48xf32> to vector<4x4xf32>
    %31 = tpu.concatenate %29, %30 in 1 : vector<4x44xf32>, vector<4x4xf32> -> vector<4x48xf32>
    %32 = arith.maximumf %28, %31 : vector<4x48xf32>
    %c0_14 = arith.constant 0 : index
    %c0_15 = arith.constant 0 : index
    %c192 = arith.constant 192 : index
    %33 = vector.load %arg1[%c0_14, %c0_15, %c192] : memref<1x4x768xf32, #tpu.memory_space<vmem>>, vector<1x4x48xf32>
    %34 = vector.shape_cast %33 : vector<1x4x48xf32> to vector<4x48xf32>
    %c0_16 = arith.constant 0 : index
    %c0_17 = arith.constant 0 : index
    %c240 = arith.constant 240 : index
    %35 = vector.load %arg1[%c0_16, %c0_17, %c240] : memref<1x4x768xf32, #tpu.memory_space<vmem>>, vector<1x4x48xf32>
    %36 = vector.shape_cast %35 : vector<1x4x48xf32> to vector<4x48xf32>
    %37 = arith.maximumf %34, %36 : vector<4x48xf32>
    %c0_18 = arith.constant 0 : index
    %c0_19 = arith.constant 0 : index
    %c288 = arith.constant 288 : index
    %38 = vector.load %arg1[%c0_18, %c0_19, %c288] : memref<1x4x768xf32, #tpu.memory_space<vmem>>, vector<1x4x48xf32>
    %39 = vector.shape_cast %38 : vector<1x4x48xf32> to vector<4x48xf32>
    %40 = arith.maximumf %37, %39 : vector<4x48xf32>
    %c0_20 = arith.constant 0 : index
    %c0_21 = arith.constant 0 : index
    %c336 = arith.constant 336 : index
    %41 = vector.load %arg1[%c0_20, %c0_21, %c336] : memref<1x4x768xf32, #tpu.memory_space<vmem>>, vector<1x4x48xf32>
    %42 = vector.shape_cast %41 : vector<1x4x48xf32> to vector<4x48xf32>
    %43 = arith.maximumf %40, %42 : vector<4x48xf32>
    %44 = vector.extract_strided_slice %43 {offsets = [0, 1], sizes = [4, 47], strides = [1, 1]} : vector<4x48xf32> to vector<4x47xf32>
    %45 = vector.extract_strided_slice %43 {offsets = [0, 0], sizes = [4, 1], strides = [1, 1]} : vector<4x48xf32> to vector<4x1xf32>
    %46 = tpu.concatenate %44, %45 in 1 : vector<4x47xf32>, vector<4x1xf32> -> vector<4x48xf32>
    %47 = arith.maximumf %43, %46 : vector<4x48xf32>
    %48 = vector.extract_strided_slice %47 {offsets = [0, 2], sizes = [4, 46], strides = [1, 1]} : vector<4x48xf32> to vector<4x46xf32>
    %49 = vector.extract_strided_slice %47 {offsets = [0, 0], sizes = [4, 2], strides = [1, 1]} : vector<4x48xf32> to vector<4x2xf32>
    %50 = tpu.concatenate %48, %49 in 1 : vector<4x46xf32>, vector<4x2xf32> -> vector<4x48xf32>
    %51 = arith.maximumf %47, %50 : vector<4x48xf32>
    %52 = vector.extract_strided_slice %51 {offsets = [0, 4], sizes = [4, 44], strides = [1, 1]} : vector<4x48xf32> to vector<4x44xf32>
    %53 = vector.extract_strided_slice %51 {offsets = [0, 0], sizes = [4, 4], strides = [1, 1]} : vector<4x48xf32> to vector<4x4xf32>
    %54 = tpu.concatenate %52, %53 in 1 : vector<4x44xf32>, vector<4x4xf32> -> vector<4x48xf32>
    %55 = arith.maximumf %51, %54 : vector<4x48xf32>
    %56 = vector.extract_strided_slice %55 {offsets = [0, 4], sizes = [4, 44], strides = [1, 1]} : vector<4x48xf32> to vector<4x44xf32>
    %57 = vector.extract_strided_slice %55 {offsets = [0, 0], sizes = [4, 4], strides = [1, 1]} : vector<4x48xf32> to vector<4x4xf32>
    %58 = tpu.concatenate %56, %57 in 1 : vector<4x44xf32>, vector<4x4xf32> -> vector<4x48xf32>
    %59 = arith.maximumf %55, %58 : vector<4x48xf32>
    %c0_22 = arith.constant 0 : index
    %c0_23 = arith.constant 0 : index
    %c384 = arith.constant 384 : index
    %60 = vector.load %arg1[%c0_22, %c0_23, %c384] : memref<1x4x768xf32, #tpu.memory_space<vmem>>, vector<1x4x48xf32>
    %61 = vector.shape_cast %60 : vector<1x4x48xf32> to vector<4x48xf32>
    %c0_24 = arith.constant 0 : index
    %c0_25 = arith.constant 0 : index
    %c432 = arith.constant 432 : index
    %62 = vector.load %arg1[%c0_24, %c0_25, %c432] : memref<1x4x768xf32, #tpu.memory_space<vmem>>, vector<1x4x48xf32>
    %63 = vector.shape_cast %62 : vector<1x4x48xf32> to vector<4x48xf32>
    %64 = arith.maximumf %61, %63 : vector<4x48xf32>
    %c0_26 = arith.constant 0 : index
    %c0_27 = arith.constant 0 : index
    %c480 = arith.constant 480 : index
    %65 = vector.load %arg1[%c0_26, %c0_27, %c480] : memref<1x4x768xf32, #tpu.memory_space<vmem>>, vector<1x4x48xf32>
    %66 = vector.shape_cast %65 : vector<1x4x48xf32> to vector<4x48xf32>
    %67 = arith.maximumf %64, %66 : vector<4x48xf32>
    %c0_28 = arith.constant 0 : index
    %c0_29 = arith.constant 0 : index
    %c528 = arith.constant 528 : index
    %68 = vector.load %arg1[%c0_28, %c0_29, %c528] : memref<1x4x768xf32, #tpu.memory_space<vmem>>, vector<1x4x48xf32>
    %69 = vector.shape_cast %68 : vector<1x4x48xf32> to vector<4x48xf32>
    %70 = arith.maximumf %67, %69 : vector<4x48xf32>
    %71 = vector.extract_strided_slice %70 {offsets = [0, 1], sizes = [4, 47], strides = [1, 1]} : vector<4x48xf32> to vector<4x47xf32>
    %72 = vector.extract_strided_slice %70 {offsets = [0, 0], sizes = [4, 1], strides = [1, 1]} : vector<4x48xf32> to vector<4x1xf32>
    %73 = tpu.concatenate %71, %72 in 1 : vector<4x47xf32>, vector<4x1xf32> -> vector<4x48xf32>
    %74 = arith.maximumf %70, %73 : vector<4x48xf32>
    %75 = vector.extract_strided_slice %74 {offsets = [0, 2], sizes = [4, 46], strides = [1, 1]} : vector<4x48xf32> to vector<4x46xf32>
    %76 = vector.extract_strided_slice %74 {offsets = [0, 0], sizes = [4, 2], strides = [1, 1]} : vector<4x48xf32> to vector<4x2xf32>
    %77 = tpu.concatenate %75, %76 in 1 : vector<4x46xf32>, vector<4x2xf32> -> vector<4x48xf32>
    %78 = arith.maximumf %74, %77 : vector<4x48xf32>
    %79 = vector.extract_strided_slice %78 {offsets = [0, 4], sizes = [4, 44], strides = [1, 1]} : vector<4x48xf32> to vector<4x44xf32>
    %80 = vector.extract_strided_slice %78 {offsets = [0, 0], sizes = [4, 4], strides = [1, 1]} : vector<4x48xf32> to vector<4x4xf32>
    %81 = tpu.concatenate %79, %80 in 1 : vector<4x44xf32>, vector<4x4xf32> -> vector<4x48xf32>
    %82 = arith.maximumf %78, %81 : vector<4x48xf32>
    %83 = vector.extract_strided_slice %82 {offsets = [0, 4], sizes = [4, 44], strides = [1, 1]} : vector<4x48xf32> to vector<4x44xf32>
    %84 = vector.extract_strided_slice %82 {offsets = [0, 0], sizes = [4, 4], strides = [1, 1]} : vector<4x48xf32> to vector<4x4xf32>
    %85 = tpu.concatenate %83, %84 in 1 : vector<4x44xf32>, vector<4x4xf32> -> vector<4x48xf32>
    %86 = arith.maximumf %82, %85 : vector<4x48xf32>
    %c0_30 = arith.constant 0 : index
    %c0_31 = arith.constant 0 : index
    %c576 = arith.constant 576 : index
    %87 = vector.load %arg1[%c0_30, %c0_31, %c576] : memref<1x4x768xf32, #tpu.memory_space<vmem>>, vector<1x4x48xf32>
    %88 = vector.shape_cast %87 : vector<1x4x48xf32> to vector<4x48xf32>
    %c0_32 = arith.constant 0 : index
    %c0_33 = arith.constant 0 : index
    %c624 = arith.constant 624 : index
    %89 = vector.load %arg1[%c0_32, %c0_33, %c624] : memref<1x4x768xf32, #tpu.memory_space<vmem>>, vector<1x4x48xf32>
    %90 = vector.shape_cast %89 : vector<1x4x48xf32> to vector<4x48xf32>
    %91 = arith.maximumf %88, %90 : vector<4x48xf32>
    %c0_34 = arith.constant 0 : index
    %c0_35 = arith.constant 0 : index
    %c672 = arith.constant 672 : index
    %92 = vector.load %arg1[%c0_34, %c0_35, %c672] : memref<1x4x768xf32, #tpu.memory_space<vmem>>, vector<1x4x48xf32>
    %93 = vector.shape_cast %92 : vector<1x4x48xf32> to vector<4x48xf32>
    %94 = arith.maximumf %91, %93 : vector<4x48xf32>
    %c0_36 = arith.constant 0 : index
    %c0_37 = arith.constant 0 : index
    %c720 = arith.constant 720 : index
    %95 = vector.load %arg1[%c0_36, %c0_37, %c720] : memref<1x4x768xf32, #tpu.memory_space<vmem>>, vector<1x4x48xf32>
    %96 = vector.shape_cast %95 : vector<1x4x48xf32> to vector<4x48xf32>
    %97 = arith.maximumf %94, %96 : vector<4x48xf32>
    %98 = vector.extract_strided_slice %97 {offsets = [0, 1], sizes = [4, 47], strides = [1, 1]} : vector<4x48xf32> to vector<4x47xf32>
    %99 = vector.extract_strided_slice %97 {offsets = [0, 0], sizes = [4, 1], strides = [1, 1]} : vector<4x48xf32> to vector<4x1xf32>
    %100 = tpu.concatenate %98, %99 in 1 : vector<4x47xf32>, vector<4x1xf32> -> vector<4x48xf32>
    %101 = arith.maximumf %97, %100 : vector<4x48xf32>
    %102 = vector.extract_strided_slice %101 {offsets = [0, 2], sizes = [4, 46], strides = [1, 1]} : vector<4x48xf32> to vector<4x46xf32>
    %103 = vector.extract_strided_slice %101 {offsets = [0, 0], sizes = [4, 2], strides = [1, 1]} : vector<4x48xf32> to vector<4x2xf32>
    %104 = tpu.concatenate %102, %103 in 1 : vector<4x46xf32>, vector<4x2xf32> -> vector<4x48xf32>
    %105 = arith.maximumf %101, %104 : vector<4x48xf32>
    %106 = vector.extract_strided_slice %105 {offsets = [0, 4], sizes = [4, 44], strides = [1, 1]} : vector<4x48xf32> to vector<4x44xf32>
    %107 = vector.extract_strided_slice %105 {offsets = [0, 0], sizes = [4, 4], strides = [1, 1]} : vector<4x48xf32> to vector<4x4xf32>
    %108 = tpu.concatenate %106, %107 in 1 : vector<4x44xf32>, vector<4x4xf32> -> vector<4x48xf32>
    %109 = arith.maximumf %105, %108 : vector<4x48xf32>
    %110 = vector.extract_strided_slice %109 {offsets = [0, 4], sizes = [4, 44], strides = [1, 1]} : vector<4x48xf32> to vector<4x44xf32>
    %111 = vector.extract_strided_slice %109 {offsets = [0, 0], sizes = [4, 4], strides = [1, 1]} : vector<4x48xf32> to vector<4x4xf32>
    %112 = tpu.concatenate %110, %111 in 1 : vector<4x44xf32>, vector<4x4xf32> -> vector<4x48xf32>
    %113 = arith.maximumf %109, %112 : vector<4x48xf32>
    %114 = tpu.concatenate %32, %59, %86, %113 in 1 : vector<4x48xf32>, vector<4x48xf32>, vector<4x48xf32>, vector<4x48xf32> -> vector<4x192xf32>
    %c0_38 = arith.constant 0 : index
    %c0_39 = arith.constant 0 : index
    %115 = vector.load %arg3[%c0_38, %c0_39] : memref<192x16xf32, #tpu.memory_space<vmem>>, vector<192x16xf32>
    %cst_40 = arith.constant dense<0.000000e+00> : vector<4x16xf32>
    %116 = tpu.matmul %114, %115, %cst_40 {dimension_numbers = #tpu.dot_dimension_numbers<[1], [0], [0], [1], [0, 0, 1, 1], [], []>} : vector<4x192xf32>, vector<192x16xf32>, vector<4x16xf32> -> vector<4x16xf32>
    %c0_41 = arith.constant 0 : index
    %c0_42 = arith.constant 0 : index
    %117 = vector.load %arg4[%c0_41, %c0_42] : memref<2x4xf32, #tpu.memory_space<vmem>>, vector<2x4xf32>
    %cst_43 = arith.constant dense<0.000000e+00> : vector<2x16xf32>
    %118 = tpu.matmul %117, %5, %cst_43 {dimension_numbers = #tpu.dot_dimension_numbers<[1], [0], [0], [1], [0, 0, 1, 1], [], []>} : vector<2x4xf32>, vector<4x16xf32>, vector<2x16xf32> -> vector<2x16xf32>
    %c0_44 = arith.constant 0 : index
    %c0_45 = arith.constant 0 : index
    %119 = vector.load %arg5[%c0_44, %c0_45] : memref<2x1xf32, #tpu.memory_space<vmem>>, vector<2x1xf32>
    %120 = vector.broadcast %119 : vector<2x1xf32> to vector<2x16xf32>
    %121 = arith.addf %118, %120 : vector<2x16xf32>
    %cst_46 = arith.constant 0.000000e+00 : f32
    %122 = vector.broadcast %cst_46 : f32 to vector<2x16xf32>
    %123 = arith.maximumf %121, %122 : vector<2x16xf32>
    %c0_47 = arith.constant 0 : index
    %c0_48 = arith.constant 0 : index
    %124 = vector.load %arg6[%c0_47, %c0_48] : memref<4x2xf32, #tpu.memory_space<vmem>>, vector<4x2xf32>
    %cst_49 = arith.constant dense<0.000000e+00> : vector<4x16xf32>
    %125 = tpu.matmul %124, %123, %cst_49 {dimension_numbers = #tpu.dot_dimension_numbers<[1], [0], [0], [1], [0, 0, 1, 1], [], []>} : vector<4x2xf32>, vector<2x16xf32>, vector<4x16xf32> -> vector<4x16xf32>
    %c0_50 = arith.constant 0 : index
    %c0_51 = arith.constant 0 : index
    %126 = vector.load %arg7[%c0_50, %c0_51] : memref<4x1xf32, #tpu.memory_space<vmem>>, vector<4x1xf32>
    %127 = vector.broadcast %126 : vector<4x1xf32> to vector<4x16xf32>
    %128 = arith.addf %125, %127 : vector<4x16xf32>
    %c0_52 = arith.constant 0 : index
    %c0_53 = arith.constant 0 : index
    %129 = vector.load %arg8[%c0_52, %c0_53] : memref<2x4xf32, #tpu.memory_space<vmem>>, vector<2x4xf32>
    %cst_54 = arith.constant dense<0.000000e+00> : vector<2x16xf32>
    %130 = tpu.matmul %129, %116, %cst_54 {dimension_numbers = #tpu.dot_dimension_numbers<[1], [0], [0], [1], [0, 0, 1, 1], [], []>} : vector<2x4xf32>, vector<4x16xf32>, vector<2x16xf32> -> vector<2x16xf32>
    %c0_55 = arith.constant 0 : index
    %c0_56 = arith.constant 0 : index
    %131 = vector.load %arg9[%c0_55, %c0_56] : memref<2x1xf32, #tpu.memory_space<vmem>>, vector<2x1xf32>
    %132 = vector.broadcast %131 : vector<2x1xf32> to vector<2x16xf32>
    %133 = arith.addf %130, %132 : vector<2x16xf32>
    %cst_57 = arith.constant 0.000000e+00 : f32
    %134 = vector.broadcast %cst_57 : f32 to vector<2x16xf32>
    %135 = arith.maximumf %133, %134 : vector<2x16xf32>
    %c0_58 = arith.constant 0 : index
    %c0_59 = arith.constant 0 : index
    %136 = vector.load %arg10[%c0_58, %c0_59] : memref<4x2xf32, #tpu.memory_space<vmem>>, vector<4x2xf32>
    %cst_60 = arith.constant dense<0.000000e+00> : vector<4x16xf32>
    %137 = tpu.matmul %136, %135, %cst_60 {dimension_numbers = #tpu.dot_dimension_numbers<[1], [0], [0], [1], [0, 0, 1, 1], [], []>} : vector<4x2xf32>, vector<2x16xf32>, vector<4x16xf32> -> vector<4x16xf32>
    %c0_61 = arith.constant 0 : index
    %c0_62 = arith.constant 0 : index
    %138 = vector.load %arg11[%c0_61, %c0_62] : memref<4x1xf32, #tpu.memory_space<vmem>>, vector<4x1xf32>
    %139 = vector.broadcast %138 : vector<4x1xf32> to vector<4x16xf32>
    %140 = arith.addf %137, %139 : vector<4x16xf32>
    %141 = arith.addf %128, %140 : vector<4x16xf32>
    %142 = arith.negf %141 : vector<4x16xf32>
    %143 = math.exp %142 : vector<4x16xf32>
    %cst_63 = arith.constant 1.000000e+00 : f32
    %144 = vector.broadcast %cst_63 : f32 to vector<4x16xf32>
    %145 = arith.addf %144, %143 : vector<4x16xf32>
    %146 = arith.divf %144, %145 : vector<4x16xf32>
    %c0_64 = arith.constant 0 : index
    %c0_65 = arith.constant 0 : index
    %c0_66 = arith.constant 0 : index
    %147 = vector.load %arg12[%c0_64, %c0_65, %c0_66] : memref<1x4x16xf32, #tpu.memory_space<vmem>>, vector<1x4x16xf32>
    %148 = vector.shape_cast %147 : vector<1x4x16xf32> to vector<4x16xf32>
    %149 = vector.shape_cast %146 : vector<4x16xf32> to vector<1x4x16xf32>
    tpu.vector_store %arg12[%c0_64, %c0_65, %c0_66], %149 {strides = array<i32>} : memref<1x4x16xf32, #tpu.memory_space<vmem>>, vector<1x4x16xf32>,
    return
  }
  func.func @transform_0(%arg0: i32) -> (i32, i32, i32) {
    %c0_i32 = arith.constant 0 : i32
    %c0_i32_0 = arith.constant 0 : i32
    %c0_i32_1 = arith.constant 0 : i32
    return %arg0, %c0_i32, %c0_i32_0 : i32, i32, i32
  }
  func.func @transform_1(%arg0: i32) -> (i32, i32) {
    %c0_i32 = arith.constant 0 : i32
    %c0_i32_0 = arith.constant 0 : i32
    %c0_i32_1 = arith.constant 0 : i32
    return %c0_i32, %c0_i32_0 : i32, i32
  }
  func.func @transform_2(%arg0: i32) -> (i32, i32) {
    %c0_i32 = arith.constant 0 : i32
    %c0_i32_0 = arith.constant 0 : i32
    %c0_i32_1 = arith.constant 0 : i32
    return %c0_i32, %c0_i32_0 : i32, i32
  }
  func.func @transform_3(%arg0: i32) -> (i32, i32) {
    %c0_i32 = arith.constant 0 : i32
    %c0_i32_0 = arith.constant 0 : i32
    %c0_i32_1 = arith.constant 0 : i32
    return %c0_i32, %c0_i32_0 : i32, i32
  }
  func.func @transform_4(%arg0: i32) -> (i32, i32) {
    %c0_i32 = arith.constant 0 : i32
    %c0_i32_0 = arith.constant 0 : i32
    %c0_i32_1 = arith.constant 0 : i32
    return %c0_i32, %c0_i32_0 : i32, i32
  }
  func.func @transform_5(%arg0: i32) -> (i32, i32) {
    %c0_i32 = arith.constant 0 : i32
    %c0_i32_0 = arith.constant 0 : i32
    %c0_i32_1 = arith.constant 0 : i32
    return %c0_i32, %c0_i32_0 : i32, i32
  }
  func.func @transform_6(%arg0: i32) -> (i32, i32) {
    %c0_i32 = arith.constant 0 : i32
    %c0_i32_0 = arith.constant 0 : i32
    %c0_i32_1 = arith.constant 0 : i32
    return %c0_i32, %c0_i32_0 : i32, i32
  }
  func.func @transform_7(%arg0: i32) -> (i32, i32) {
    %c0_i32 = arith.constant 0 : i32
    %c0_i32_0 = arith.constant 0 : i32
    %c0_i32_1 = arith.constant 0 : i32
    return %c0_i32, %c0_i32_0 : i32, i32
  }
  func.func @transform_8(%arg0: i32) -> (i32, i32) {
    %c0_i32 = arith.constant 0 : i32
    %c0_i32_0 = arith.constant 0 : i32
    %c0_i32_1 = arith.constant 0 : i32
    return %c0_i32, %c0_i32_0 : i32, i32
  }
  func.func @transform_9(%arg0: i32) -> (i32, i32) {
    %c0_i32 = arith.constant 0 : i32
    %c0_i32_0 = arith.constant 0 : i32
    %c0_i32_1 = arith.constant 0 : i32
    return %c0_i32, %c0_i32_0 : i32, i32
  }
  func.func @transform_10(%arg0: i32) -> (i32, i32) {
    %c0_i32 = arith.constant 0 : i32
    %c0_i32_0 = arith.constant 0 : i32
    %c0_i32_1 = arith.constant 0 : i32
    return %c0_i32, %c0_i32_0 : i32, i32
  }
  func.func @transform_11(%arg0: i32) -> (i32, i32, i32) {
    %c0_i32 = arith.constant 0 : i32
    %c0_i32_0 = arith.constant 0 : i32
    %c0_i32_1 = arith.constant 0 : i32
    return %arg0, %c0_i32, %c0_i32_0 : i32, i32, i32
  }
}

</mosaic_0001>

<bundles_post_ra>
// kernel: tpu_custom_call.1
= control target key start
LH: loop header
LB: loop body
LE: loop exit
PB: predicated region body
PF: predicated region fallthrough
CT: control target
= control target key end

     0   :  { %s2530_s0 = inlined_call_operand.vmem [shape: f32[2,4,768], index: 0, kind: input, shape index: {}]   ;;  %s2531_s1 = inlined_call_operand.vmem [shape: f32[768,16], index: 1, kind: input, shape index: {}]   ;;  %s2532_s2 = inlined_call_operand.vmem [shape: f32[192,16], index: 2, kind: input, shape index: {}]   ;;  %s2533_s3 = inlined_call_operand.vmem [shape: f32[2,4], index: 3, kind: input, shape index: {}]   ;;  %s2534_s4 = inlined_call_operand.vmem [shape: f32[2,1], index: 4, kind: input, shape index: {}]   ;;  %s2535_s5 = inlined_call_operand.vmem [shape: f32[4,2], index: 5, kind: input, shape index: {}]   ;;  %s2536_s6 = inlined_call_operand.vmem [shape: f32[4,1], index: 6, kind: input, shape index: {}]   ;;  %s2537_s7 = inlined_call_operand.vmem [shape: f32[2,4], index: 7, kind: input, shape index: {}]   ;;  %s2538_s8 = inlined_call_operand.vmem [shape: f32[2,1], index: 8, kind: input, shape index: {}]   ;;  %s2539_s9 = inlined_call_operand.vmem [shape: f32[4,2], index: 9, kind: input, shape index: {}]   ;;  %s2540_s10 = inlined_call_operand.vmem [shape: f32[4,1], index: 10, kind: input, shape index: {}]   ;;  %s2541_s11 = inlined_call_operand.hbm [shape: f32[2,4,16], index: 11, kind: output, shape index: {}]  }
   0x1   :  { %2554 = sst [smem:[#allocation5_spill]] %s2530_s0 }
   0x2   :  { %2555 = sst [smem:[#allocation6_spill]] %s2531_s1 }
   0x3   :  { %16 = vsyncpa [#allocation3], 0 }
   0x4   :  { %18 = vsyncpa [#allocation3 + $0x1], 0  ;;  %s1862_s17 = smov 0   ;;  %s1864_s18 = smov 0  }
   0x5   :  { %s1866_s19 = smov 0   ;;  %s1868_s20 = smov 0  }
   0x6 LB: > { %s1883_s21 = sadd.s32 4294967295, %s1779_s20   ;;  %s1497_s22 = sadd.s32 4294967294, %s1779_s20   ;;  %s1779_s20 = sphi %s1868_s20, %s2572_s20   ;;  %s1775_s19 = sphi %s1866_s19, %s2571_s19   ;;  %s1771_s18 = sphi %s1864_s18, %s2570_s18   ;;  %s1767_s17 = sphi %s1862_s17, %s2569_s17  }
   0x7   : > { %s1887_s23 = sadd.s32 1, %s1779_s20   ;;  %s267_s24 = sadd.s32 1, %s1775_s19 }
   0x8   : > { %s264_s25 = ssub.s32 %s1779_s20, %s1887_s23  ;;  %p277_p0 = scmp.ne.s32.totalorder %s1775_s19, %s1771_s18 }
   0x9   : > { %p265_p1 = scmp.eq.s32.totalorder %s264_s25, 0  ;;  %p278_p2 = scmp.eq.s32.totalorder %s1883_s21, 1 }
   0xa   : > { %p283_p3 = scmp.ne.s32.totalorder %s1771_s18, %s1767_s17  ;;  %p284_p4 = scmp.eq.s32.totalorder %s1497_s22, 1 }
   0xb   : > { %s1898_s26 = scalar_select %p265_p1, %s1775_s19, %s267_s24  }
   0xc   : > { %p1900_p5 = por %p278_p2, %p277_p0  ;;  %p1904_p6 = por %p284_p4, %p283_p3 }
   0xd   : > { %p1500_p7 = scmp.ge.s32.totalorder %s1779_s20, 1  ;;  %p340_p8 = scmp.lt.s32.totalorder %s1779_s20, 3 }
   0xf   : > { %p341_p9 = pnand %p1500_p7, %p340_p8 }
  0x10   : > { %p380_p10 = scmp.lt.s32.totalorder (!%p341_p9), %s1883_s21, 1  ;;  %s2558_s0 = sld [smem:[#allocation5_spill]] (!%p341_p9) }
  0x11   : > { %344 = sbr.rel (%p341_p9) target bundleno = 1840 (0x730), region = 64  ;;  %s2542_s15 = smov (!%p341_p9), 80  }
  0x12   : > { %s1782_s16 = smov (!%p341_p9), 32   ;;  %s2543_s22 = smov (!%p341_p9), 112  }
  0x13   : > { %s1784_s24 = smov (!%p341_p9), 111   ;;  %s1785_s25 = smov (!%p341_p9), 63  }
  0x14   : > { %s1788_s12 = smov (!%p341_p9), 62   ;;  %s2546_s13 = smov (!%p341_p9), 47  }
  0x15   : > { %s2559_s1 = sld [smem:[#allocation6_spill]] (!%p341_p9) }
  0x16   : > { %s381_s29 = scalar_select %p380_p10, %s1883_s21, 1  ;;  %vm769_vm0 = vcmask 654336   ;;  %vm732_vm1 = vcmask 384000   ;;  %vm742_vm2 = vcmask 375808   ;;  %vm715_vm3 = vcmask 261120  }
  0x17   : > { %vm752_vm4 = vcmask 359424   ;;  %vm1798_vm5 = vmmov 0   ;;  %vm1088_vm6 = vcmask 1043456   ;;  %vm1084_vm7 = vcmask 31744  }
  0x18   : > { %s1650_s30 = smul.u32 24, %s381_s29  ;;  %s2544_s29 = smov 64   ;;  %vm1174_vm8 = vcmask 1041408   ;;  %vm1170_vm9 = vcmask 15360   ;;  %vm973_vm10 = vcmask 392192   ;;  %vm977_vm11 = vcmask 130048  }
  0x19   : > { %vm1003_vm12 = vcmask 523264   ;;  %vm975_vm13 = vcmask 785408   ;;  %vm1422_vm14 = vcmask 125952  }
  0x1a   : > { %s1915_s14 = scalar_lea.vmem %s2558_s0, %s1650_s30  ;;  %s1787_s30 = smov 110  }
  0x1b   : > { %v764_v0 = vld [vmem:[%s1915_s14 + $0x4] sm:$0xff]  ;;  %v1922_v2 = vld [vmem:[%s1915_s14 + $0x10] sm:$0xff]  ;;  %v835_v33 = vld [vmem:[%s1915_s14 + $0xc] sm:$0xf]  ;;  %s2550_s0 = smov 108  }
  0x1c   : > { %v773_v1 = vld [vmem:[%s1915_s14 + $0x8] sm:$0xf]  ;;  %766 = vrot.lane.b32.xlu0 %v764_v0, %s2542_s15  ;;  %v899_v3 = vld [vmem:[%s1915_s14 + $0x14] sm:$0xf]  ;;  %v1931_v7 = vld [vmem:[%s1915_s14 + $0x4] sm:$0xf] }
  0x1d   : > { %775 = vrot.lane.b32.xlu1 %v773_v1, %s1782_s16  ;;  %v849_v13 = vld [vmem:[%s1915_s14 + $0x10] sm:$0xf]  ;;  %v1955_v37 = vld [vmem:[%s1915_s14] sm:$0xff]  ;;  %v419_v50 = vld [vmem:[%s2559_s1 + $0xf8] sm:$0xff] }
  0x1e   : > { %v841_v32 = vld [vmem:[%s1915_s14 + $0xc] sm:$0xff]  ;;  %v1962_v41 = vld [vmem:[%s1915_s14] sm:$0xf]  ;;  %v403_v51 = vld [vmem:[%s2559_s1 + $0x78] sm:$0xff]  ;;  %1517 = vmatprep.subr.mxu0 %v419_v50 }
  0x1f   : > { %1518 = vmatpush3.msra.mxu0 %v403_v51  ;;  %v418_v52 = vld [vmem:[%s2559_s1 + $0xf0] sm:$0xff]  ;;  %v417_v54 = vld [vmem:[%s2559_s1 + $0xe8] sm:$0xff]  ;;  %v416_v56 = vld [vmem:[%s2559_s1 + $0xe0] sm:$0xff] }
  0x20   : > { %893 = vrot.lane.b32.xlu0 %v1922_v2, %s2542_s15  ;;  %v402_v53 = vld [vmem:[%s2559_s1 + $0x70] sm:$0xff]  ;;  %1519 = vmatprep.subr.mxu0 %v418_v52  ;;  %v401_v55 = vld [vmem:[%s2559_s1 + $0x68] sm:$0xff]  ;;  %v400_v57 = vld [vmem:[%s2559_s1 + $0x60] sm:$0xff] }
  0x21   : > { %901 = vrot.lane.b32.xlu1 %v899_v3, %s1782_s16  ;;  %1520 = vmatpush3.msra.mxu0 %v402_v53  ;;  %v415_v58 = vld [vmem:[%s2559_s1 + $0xd8] sm:$0xff]  ;;  %v414_v60 = vld [vmem:[%s2559_s1 + $0xd0] sm:$0xff]  ;;  %v413_v0 = vld [vmem:[%s2559_s1 + $0xc8] sm:$0xff] }
  0x22   : > { %1521 = vmatprep.subr.mxu0 %v417_v54  ;;  %v399_v59 = vld [vmem:[%s2559_s1 + $0x58] sm:$0xff]  ;;  %v398_v61 = vld [vmem:[%s2559_s1 + $0x50] sm:$0xff]  ;;  %v445_v52 = vld [vmem:[%s2559_s1 + $0x1c8] sm:$0xff] }
  0x23   : > { %1522 = vmatpush3.msra.mxu0 %v401_v55  ;;  %v430_v50 = vld [vmem:[%s2559_s1 + $0x150] sm:$0xff]  ;;  %v429_v54 = vld [vmem:[%s2559_s1 + $0x148] sm:$0xff] }
  0x24   : > { %779 = vrot.lane.b32.xlu0 %v773_v1, %s2543_s22  ;;  %1523 = vmatprep.subr.mxu0 %v416_v56  ;;  %v397_v1 = vld [vmem:[%s2559_s1 + $0x48] sm:$0xff]  ;;  %v482_v51 = vld [vmem:[%s2559_s1 + $0x2f0] sm:$0xff]  ;;  %v444_v56 = vld [vmem:[%s2559_s1 + $0x1c0] sm:$0xff] }
  0x25   : > { %905 = vrot.lane.b32.xlu1 %v899_v3, %s2543_s22  ;;  %1524 = vmatpush3.msra.mxu0 %v400_v57  ;;  %v412_v3 = vld [vmem:[%s2559_s1 + $0xc0] sm:$0xff]  ;;  %v466_v53 = vld [vmem:[%s2559_s1 + $0x270] sm:$0xff]  ;;  %v481_v55 = vld [vmem:[%s2559_s1 + $0x2e8] sm:$0xff] }
  0x26   : > { %1525 = vmatprep.subr.mxu0 %v415_v58  ;;  %v428_v57 = vld [vmem:[%s2559_s1 + $0x140] sm:$0xff] }
  0x27   : > { %1526 = vmatpush3.msra.mxu0 %v399_v59  ;;  %v480_v58 = vld [vmem:[%s2559_s1 + $0x2e0] sm:$0xff]  ;;  %v443_v59 = vld [vmem:[%s2559_s1 + $0x1b8] sm:$0xff] }
  0x28   : > { %1527 = vmatprep.subr.mxu0 %v414_v60  ;;  %v464_v60 = vld [vmem:[%s2559_s1 + $0x260] sm:$0xff] }
  0x29   : > { %1528 = vmatpush3.msra.mxu0 %v398_v61  ;;  %v427_v61 = vld [vmem:[%s2559_s1 + $0x138] sm:$0xff] }
  0x2a   : > { %1529 = vmatprep.subr.mxu0 %v413_v0  ;;  %v442_v0 = vld [vmem:[%s2559_s1 + $0x1b0] sm:$0xff] }
  0x2b   : > { %1530 = vmatpush3.msra.mxu0 %v397_v1  ;;  %v463_v1 = vld [vmem:[%s2559_s1 + $0x258] sm:$0xff] }
  0x2c   : > { %1531 = vmatprep.subr.mxu0 %v412_v3  ;;  %v426_v3 = vld [vmem:[%s2559_s1 + $0x130] sm:$0xff] }
  0x8e   : > { %v767_v4 = vpop.permute.xlu0 %766 }
  0x8f   : > { %v776_v5 = vpop.permute.xlu1 %775  ;;  %v768_v6 = vrot.slane %v767_v4, 4 }
  0x91   : > { %v770_v8 = vsel %vm769_vm0, %v767_v4, %v768_v6  ;;  %v396_v4 = vld [vmem:[%s2559_s1 + $0x40] sm:$0xff] }
  0x92   : > { %v772_v9 = vmax.f32 %v1931_v7, %v770_v8  ;;  %v894_v10 = vpop.permute.xlu0 %893  ;;  %1532 = vmatpush3.msra.mxu0 %v396_v4  ;;  %v478_v4 = vld [vmem:[%s2559_s1 + $0x2d0] sm:$0xff] }
  0x93   : > { %v902_v11 = vpop.permute.xlu1 %901  ;;  %v895_v12 = vrot.slane %v894_v10, 4 }
  0x94   : > { %v778_v14 = vmax.f32 %v772_v9, %v776_v5  ;;  %v411_v9 = vld [vmem:[%s2559_s1 + $0xb8] sm:$0xff] }
  0x95   : > { %v896_v15 = vsel %vm769_vm0, %v894_v10, %v895_v12  ;;  %v395_v10 = vld [vmem:[%s2559_s1 + $0x38] sm:$0xff]  ;;  %1533 = vmatprep.subr.mxu0 %v411_v9  ;;  %v477_v9 = vld [vmem:[%s2559_s1 + $0x2c8] sm:$0xff] }
  0x96   : > { %v898_v16 = vmax.f32 %v849_v13, %v896_v15  ;;  %v780_v17 = vpop.permute.xlu0 %779  ;;  %v394_v15 = vld [vmem:[%s2559_s1 + $0x30] sm:$0xff]  ;;  %1534 = vmatpush3.msra.mxu0 %v395_v10  ;;  %v440_v10 = vld [vmem:[%s2559_s1 + $0x1a0] sm:$0xff] }
  0x97   : > { %v782_v18 = vmax.f32 %v778_v14, %v780_v17  ;;  %v906_v19 = vpop.permute.xlu1 %905  ;;  %v409_v17 = vld [vmem:[%s2559_s1 + $0xa8] sm:$0xff] }
  0x98   : > { %v904_v20 = vmax.f32 %v898_v16, %v902_v11  ;;  %v410_v11 = vld [vmem:[%s2559_s1 + $0xb0] sm:$0xff] }
  0x99   : > { %787 = vrot.lane.b32.xlu1 %v782_v18, %s1784_s24  ;;  %784 = vrot.lane.b32.xlu0 %v782_v18, %s1785_s25 }
  0x9a   : > { %v908_v21 = vmax.f32 %v904_v20, %v906_v19  ;;  %1535 = vmatprep.subr.mxu0 %v410_v11  ;;  %v393_v19 = vld [vmem:[%s2559_s1 + $0x28] sm:$0xff] }
  0x9b   : > { %1536 = vmatpush3.msra.mxu0 %v394_v15  ;;  %v461_v11 = vld [vmem:[%s2559_s1 + $0x248] sm:$0xff]  ;;  %v460_v15 = vld [vmem:[%s2559_s1 + $0x240] sm:$0xff] }
  0x9c   : > { %1537 = vmatprep.subr.mxu0 %v409_v17  ;;  %v475_v17 = vld [vmem:[%s2559_s1 + $0x2b8] sm:$0xff] }
  0x9d   : > { %913 = vrot.lane.b32.xlu1 %v908_v21, %s1784_s24  ;;  %910 = vrot.lane.b32.xlu0 %v908_v21, %s1785_s25  ;;  %s2566_s24 = smov 60  }
  0x9e   : > { %1538 = vmatpush3.msra.mxu0 %v393_v19  ;;  %v459_v19 = vld [vmem:[%s2559_s1 + $0x238] sm:$0xff] }
 0x10b   : > { %v788_v22 = vpop.permute.xlu1 %787  ;;  %v785_v23 = vpop.permute.xlu0 %784 }
 0x10c   : > { %v790_v24 = vsel %vm732_vm1, %v785_v23, %v788_v22  ;;  %v451_v22 = vld [vmem:[%s2559_s1 + $0x1f8] sm:$0xff] }
 0x10d   : > { %792 = vrot.lane.b32.xlu0 %v790_v24, %s2544_s29  ;;  %v392_v24 = vld [vmem:[%s2559_s1 + $0x20] sm:$0xff]  ;;  %1552 = vmatprep.subr.mxu1 %v451_v22  ;;  %v437_v22 = vld [vmem:[%s2559_s1 + $0x188] sm:$0xff] }
 0x10f   : > { %v914_v25 = vpop.permute.xlu1 %913  ;;  %v911_v26 = vpop.permute.xlu0 %910 }
 0x110   : > { %v916_v27 = vsel %vm732_vm1, %v911_v26, %v914_v25  ;;  %v435_v25 = vld [vmem:[%s2559_s1 + $0x178] sm:$0xff]  ;;  %v450_v26 = vld [vmem:[%s2559_s1 + $0x1f0] sm:$0xff] }
 0x111   : > { %918 = vrot.lane.b32.xlu1 %v916_v27, %s2544_s29  ;;  %1553 = vmatpush3.msra.mxu1 %v435_v25  ;;  %v458_v25 = vld [vmem:[%s2559_s1 + $0x230] sm:$0xff] }
 0x112   : > { %1554 = vmatprep.subr.mxu1 %v450_v26  ;;  %v421_v26 = vld [vmem:[%s2559_s1 + $0x108] sm:$0xff] }
 0x17f   : > { %v793_v28 = vpop.permute.xlu0 %792 }
 0x180   : > { %v1939_v29 = vmax.f32 %v782_v18, %v793_v28  ;;  %v487_v18 = vcombine.high %v1955_v37, %v1955_v37 }
 0x182   : > { %800 = vrot.lane.b32.xlu1 %v1939_v29, %s1787_s30  ;;  %797 = vrot.lane.b32.xlu0 %v1939_v29, %s1788_s12 }
 0x183   : > { %v919_v30 = vpop.permute.xlu1 %918  ;;  %557 = vmatprep.mubr.f32.mxu0 %v487_v18  ;;  %v438_v18 = vld [vmem:[%s2559_s1 + $0x190] sm:$0xff] }
 0x184   : > { %v1943_v31 = vmax.f32 %v908_v21, %v919_v30  ;;  %v408_v21 = vld [vmem:[%s2559_s1 + $0xa0] sm:$0xff]  ;;  %v434_v30 = vld [vmem:[%s2559_s1 + $0x170] sm:$0xff] }
 0x185   : > { %1539 = vmatprep.subr.mxu0 %v408_v21  ;;  %1555 = vmatpush3.msra.mxu1 %v434_v30  ;;  %v474_v21 = vld [vmem:[%s2559_s1 + $0x2b0] sm:$0xff]  ;;  %v420_v30 = vld [vmem:[%s2559_s1 + $0x100] sm:$0xff] }
 0x186   : > { %926 = vrot.lane.b32.xlu1 %v1943_v31, %s1787_s30  ;;  %923 = vrot.lane.b32.xlu0 %v1943_v31, %s1788_s12  ;;  %s2553_s30 = smov 46   ;;  %s2563_s12 = smov 46  }
 0x187   : > { %1540 = vmatpush3.msra.mxu0 %v392_v24  ;;  %v386_v24 = vld [vmem:[%s1915_s14 + $0x8] sm:$0xff]  ;;  %s1801_s14 = smov [#allocation2]  }
 0x18a   : > { %843 = vrot.lane.b32.xlu0 %v841_v32, %s1782_s16  ;;  %837 = vrot.lane.b32.xlu1 %v835_v33, %s2542_s15  ;;  %v391_v32 = vld [vmem:[%s2559_s1 + $0x18] sm:$0xff] }
 0x18e   : > { %851 = vrot.lane.b32.xlu0 %v849_v13, %s2543_s22 }
 0x1f4   : > { %v801_v34 = vpop.permute.xlu1 %800  ;;  %v798_v35 = vpop.permute.xlu0 %797 }
 0x1f5   : > { %v803_v36 = vsel %vm742_vm2, %v798_v35, %v801_v34  ;;  %v406_v35 = vld [vmem:[%s2559_s1 + $0x90] sm:$0xff] }
 0x1f6   : > { %805 = vrot.lane.b32.xlu1 %v803_v36, %s2544_s29  ;;  %v433_v36 = vld [vmem:[%s2559_s1 + $0x168] sm:$0xff] }
 0x1f8   : > { %v927_v38 = vpop.permute.xlu1 %926  ;;  %v924_v39 = vpop.permute.xlu0 %923 }
 0x1f9   : > { %v929_v40 = vsel %vm742_vm2, %v924_v39, %v927_v38  ;;  %v390_v38 = vld [vmem:[%s2559_s1 + $0x10] sm:$0xff]  ;;  %v448_v39 = vld [vmem:[%s2559_s1 + $0x1e0] sm:$0xff] }
 0x1fa   : > { %931 = vrot.lane.b32.xlu0 %v929_v40, %s2544_s29  ;;  %712 = vrot.lane.b32.xlu1 %v1955_v37, %s1782_s16  ;;  %s2547_s16 = smov 127   ;;  %s2561_s29 = smov 127   ;;  %v405_v40 = vld [vmem:[%s2559_s1 + $0x88] sm:$0xff] }
 0x1fc   : > { %v844_v42 = vpop.permute.xlu0 %843  ;;  %v838_v43 = vpop.permute.xlu1 %837 }
 0x1fd   : > { %v845_v44 = vrot.slane %v844_v42, 4  ;;  %v840_v45 = vmax.f32 %v835_v33, %v838_v43  ;;  %v449_v33 = vld [vmem:[%s2559_s1 + $0x1e8] sm:$0xff]  ;;  %v447_v43 = vld [vmem:[%s2559_s1 + $0x1d8] sm:$0xff] }
 0x1fe   : > { %706 = vrot.lane.b32.xlu0 %v1962_v41, %s2542_s15  ;;  %721 = vrot.lane.b32.xlu1 %v1931_v7, %s2543_s22  ;;  %s2560_s22 = smov 47   ;;  %s2564_s15 = smov 126  }
 0x1ff   : > { %v846_v46 = vsel %vm715_vm3, %v844_v42, %v845_v44  ;;  %1556 = vmatprep.subr.mxu1 %v449_v33  ;;  %v389_v42 = vld [vmem:[%s2559_s1 + $0x8] sm:$0xff]  ;;  %v404_v44 = vld [vmem:[%s2559_s1 + $0x80] sm:$0xff] }
 0x200   : > { %v848_v47 = vmax.f32 %v840_v45, %v846_v46  ;;  %v852_v48 = vpop.permute.xlu0 %851  ;;  %1557 = vmatpush3.msra.mxu1 %v433_v36  ;;  %v431_v45 = vld [vmem:[%s2559_s1 + $0x158] sm:$0xff]  ;;  %v388_v46 = vld [vmem:[%s2559_s1] sm:$0xff] }
 0x201   : > { %1558 = vmatprep.subr.mxu1 %v448_v39  ;;  %v456_v33 = vld [vmem:[%s2559_s1 + $0x220] sm:$0xff]  ;;  %v471_v36 = vld [vmem:[%s2559_s1 + $0x298] sm:$0xff]  ;;  %v470_v39 = vld [vmem:[%s2559_s1 + $0x290] sm:$0xff] }
 0x202   : > { %v1969_v49 = vmax.f32 %v848_v47, %v852_v48  ;;  %v446_v47 = vld [vmem:[%s2559_s1 + $0x1d0] sm:$0xff]  ;;  %v483_v48 = vld [vmem:[%s2559_s1 + $0x2f8] sm:$0xff] }
 0x204   : > { %859 = vrot.lane.b32.xlu1 %v1969_v49, %s2546_s13  ;;  %856 = vrot.lane.b32.xlu0 %v1969_v49, %s2547_s16  ;;  %s2548_s16 = smov 60   ;;  %s2565_s13 = smov 108  }
 0x268   : > { %v806_v62 = vpop.permute.xlu1 %805 }
 0x269   : > { %v2012_v63 = vmax.f32 %v1939_v29, %v806_v62  ;;  %v407_v29 = vld [vmem:[%s2559_s1 + $0x98] sm:$0xff] }
 0x26a   : > { %1541 = vmatprep.subr.mxu0 %v407_v29  ;;  %v479_v62 = vld [vmem:[%s2559_s1 + $0x2d8] sm:$0xff]  ;;  %v457_v29 = vld [vmem:[%s2559_s1 + $0x228] sm:$0xff] }
 0x26b   : > { %813 = vrot.lane.b32.xlu1 %v2012_v63, %s2550_s0  ;;  %810 = vrot.lane.b32.xlu0 %v2012_v63, %s2548_s16 }
 0x26c   : > { %v932_v5 = vpop.permute.xlu0 %931  ;;  %v713_v6 = vpop.permute.xlu1 %712  ;;  %1542 = vmatpush3.msra.mxu0 %v391_v32  ;;  %v472_v32 = vld [vmem:[%s2559_s1 + $0x2a0] sm:$0xff] }
 0x26d   : > { %v2031_v7 = vmax.f32 %v1943_v31, %v932_v5  ;;  %v714_v8 = vrot.slane %v713_v6, 4  ;;  %1543 = vmatprep.subr.mxu0 %v406_v35  ;;  %v441_v5 = vld [vmem:[%s2559_s1 + $0x1a8] sm:$0xff]  ;;  %v489_v35 = vcombine.high %v1922_v2, %v1922_v2 }
 0x26e   : > { %1544 = vmatpush3.msra.mxu0 %v390_v38  ;;  %v455_v38 = vld [vmem:[%s2559_s1 + $0x218] sm:$0xff] }
 0x26f   : > { %939 = vrot.lane.b32.xlu1 %v2031_v7, %s2550_s0  ;;  %936 = vrot.lane.b32.xlu0 %v2031_v7, %s2548_s16  ;;  %v716_v12 = vsel %vm715_vm3, %v713_v6, %v714_v8  ;;  %s2552_s16 = smov 126   ;;  %v462_v6 = vld [vmem:[%s2559_s1 + $0x250] sm:$0xff]  ;;  %v425_v8 = vld [vmem:[%s2559_s1 + $0x128] sm:$0xff] }
 0x270   : > { %v707_v13 = vpop.permute.xlu0 %706  ;;  %v722_v14 = vpop.permute.xlu1 %721  ;;  %1545 = vmatprep.subr.mxu0 %v405_v40  ;;  %v454_v40 = vld [vmem:[%s2559_s1 + $0x210] sm:$0xff] }
 0x271   : > { %v709_v16 = vmax.f32 %v1962_v41, %v707_v13  ;;  %v432_v41 = vld [vmem:[%s2559_s1 + $0x160] sm:$0xff]  ;;  %1546 = vmatpush3.msra.mxu0 %v389_v42  ;;  %v453_v42 = vld [vmem:[%s2559_s1 + $0x208] sm:$0xff] }
 0x272   : > { %1559 = vmatpush3.msra.mxu1 %v432_v41  ;;  %1547 = vmatprep.subr.mxu0 %v404_v44  ;;  %v476_v13 = vld [vmem:[%s2559_s1 + $0x2c0] sm:$0xff]  ;;  %v469_v41 = vld [vmem:[%s2559_s1 + $0x288] sm:$0xff] }
 0x273   : > { %v718_v20 = vmax.f32 %v709_v16, %v716_v12  ;;  %1560 = vmatprep.subr.mxu1 %v447_v43  ;;  %1548 = vmatpush3.msra.mxu0 %v388_v46  ;;  %v424_v12 = vld [vmem:[%s2559_s1 + $0x120] sm:$0xff]  ;;  %v423_v16 = vld [vmem:[%s2559_s1 + $0x118] sm:$0xff] }
 0x274   : > { %1561 = vmatpush3.msra.mxu1 %v431_v45  ;;  %1587 = vmatprep.subr.mxu0 %v483_v48  ;;  %v468_v43 = vld [vmem:[%s2559_s1 + $0x280] sm:$0xff] }
 0x275   : > { %v2065_v23 = vmax.f32 %v718_v20, %v722_v14  ;;  %1562 = vmatprep.subr.mxu1 %v446_v47  ;;  %558 = vmatmul.mubr.f32.vlgmr.msra.gmra.mxu0 %v1955_v37  ;;  %v465_v37 = vld [vmem:[%s2559_s1 + $0x268] sm:$0xff]  ;;  %v439_v14 = vld [vmem:[%s2559_s1 + $0x198] sm:$0xff]  ;;  %v422_v20 = vld [vmem:[%s2559_s1 + $0x110] sm:$0xff] }
 0x276   : > { %v860_v27 = vpop.permute.xlu1 %859  ;;  %v857_v28 = vpop.permute.xlu0 %856  ;;  %1563 = vmatpush3.msra.mxu1 %v430_v50  ;;  %697 = vmatprep.mubr.f32.mxu0 %v489_v35  ;;  %v452_v44 = vld [vmem:[%s2559_s1 + $0x200] sm:$0xff] }
 0x277   : > { %v862_v31 = vsel %vm732_vm1, %v857_v28, %v860_v27  ;;  %729 = vrot.lane.b32.xlu1 %v2065_v23, %s2560_s22  ;;  %726 = vrot.lane.b32.xlu0 %v2065_v23, %s2561_s29  ;;  %v473_v27 = vld [vmem:[%s2559_s1 + $0x2a8] sm:$0xff]  ;;  %v436_v28 = vld [vmem:[%s2559_s1 + $0x180] sm:$0xff]  ;;  %s1795_s22 = smov 44   ;;  %s1796_s29 = smov 124  }
 0x278   : > { %v2094_v34 = vmax.f32 %v1969_v49, %v862_v31  ;;  %v467_v49 = vld [vmem:[%s2559_s1 + $0x278] sm:$0xff]  ;;  %1564 = vmatprep.subr.mxu1 %v445_v52  ;;  %v488_v31 = vcombine.high %v386_v24, %v386_v24  ;;  %s1723_s1 = sshll.u32 %s1801_s14, 4  ;;  %s1724_s1 = int_to_ptr.vmem [resolvable:$false] %s1723_s1 }
 0x279   : > { %1588 = vmatpush3.msra.mxu0 %v467_v49  ;;  %1565 = vmatpush3.msra.mxu1 %v429_v54 }
 0x27a   : > { %1589 = vmatprep.subr.mxu0 %v482_v51  ;;  %1566 = vmatprep.subr.mxu1 %v444_v56 }
 0x27b   : > { %868 = vrot.lane.b32.xlu1 %v2094_v34, %s2553_s30  ;;  %865 = vrot.lane.b32.xlu0 %v2094_v34, %s2552_s16  ;;  %s2562_s16 = smov 64   ;;  %s377_s30 = sand.u32 1, %s1771_s18  }
 0x27c   : > { %1590 = vmatpush3.msra.mxu0 %v466_v53  ;;  %1567 = vmatpush3.msra.mxu1 %v428_v57 }
 0x27d   : > { %1591 = vmatprep.subr.mxu0 %v481_v55  ;;  %1568 = vmatprep.subr.mxu1 %v443_v59 }
 0x27e   : > { %1592 = vmatpush3.msra.mxu0 %v465_v37  ;;  %1569 = vmatpush3.msra.mxu1 %v427_v61 }
 0x27f   : > { %1593 = vmatprep.subr.mxu0 %v480_v58  ;;  %1570 = vmatprep.subr.mxu1 %v442_v0 }
 0x280   : > { %1594 = vmatpush3.msra.mxu0 %v464_v60  ;;  %1571 = vmatpush3.msra.mxu1 %v426_v3 }
 0x281   : > { %1595 = vmatprep.subr.mxu0 %v479_v62  ;;  %1572 = vmatprep.subr.mxu1 %v441_v5  ;;  %v1797_v62 = vmov 0.0  }
 0x282   : > { %1596 = vmatpush3.msra.mxu0 %v463_v1  ;;  %1573 = vmatpush3.msra.mxu1 %v425_v8 }
 0x283   : > { %1597 = vmatprep.subr.mxu0 %v478_v4  ;;  %1574 = vmatprep.subr.mxu1 %v440_v10  ;;  %v1799_v4 = vmov 0  }
 0x284   : > { %1598 = vmatpush3.msra.mxu0 %v462_v6  ;;  %1575 = vmatpush3.msra.mxu1 %v424_v12 }
 0x285   : > { %1599 = vmatprep.subr.mxu0 %v477_v9  ;;  %1576 = vmatprep.subr.mxu1 %v439_v14 }
 0x286   : > { %1600 = vmatpush3.msra.mxu0 %v461_v11  ;;  %1577 = vmatpush3.msra.mxu1 %v423_v16 }
 0x287   : > { %1601 = vmatprep.subr.mxu0 %v476_v13  ;;  %1578 = vmatprep.subr.mxu1 %v438_v18  ;;  %v1077_v18 = vld [vmem:[%s2533_s3] sm:$0x3] }
 0x288   : > { %1602 = vmatpush3.msra.mxu0 %v460_v15  ;;  %1579 = vmatpush3.msra.mxu1 %v422_v20 }
 0x289   : > { %1603 = vmatprep.subr.mxu0 %v475_v17  ;;  %1580 = vmatprep.subr.mxu1 %v437_v22 }
 0x28a   : > { %1604 = vmatpush3.msra.mxu0 %v459_v19  ;;  %1581 = vmatpush3.msra.mxu1 %v421_v26  ;;  %v994_v26 = vld [vmem:[%s2532_s2 + $0x78] sm:$0xff] }
 0x28b   : > { %1605 = vmatprep.subr.mxu0 %v474_v21  ;;  %1582 = vmatprep.subr.mxu1 %v436_v28  ;;  %v992_v28 = vld [vmem:[%s2532_s2 + $0x68] sm:$0xff] }
 0x28c   : > { %1606 = vmatpush3.msra.mxu0 %v458_v25  ;;  %1583 = vmatpush3.msra.mxu1 %v420_v30 }
 0x28d   : > { %1607 = vmatprep.subr.mxu0 %v473_v27  ;;  %627 = vmatprep.mubr.f32.mxu1 %v488_v31  ;;  %v993_v27 = vld [vmem:[%s2532_s2 + $0x70] sm:$0xff] }
 0x28e   : > { %1608 = vmatpush3.msra.mxu0 %v457_v29  ;;  %628 = vmatmul.mubr.f32.vlgmr.msra.gmra.mxu1 %v386_v24  ;;  %v991_v29 = vld [vmem:[%s2532_s2 + $0x60] sm:$0xff] }
 0x28f   : > { %1609 = vmatprep.subr.mxu0 %v472_v32  ;;  %1710 = vset.pattern.permute.xlu1 %v1799_v4  ;;  %v990_v32 = vld [vmem:[%s2532_s2 + $0x58] sm:$0xff] }
 0x290   : > { %1610 = vmatpush3.msra.mxu0 %v456_v33  ;;  %1007 = vmatprep.subr.mxu1 %v1797_v62 }
 0x291   : > { %1611 = vmatprep.subr.mxu0 %v471_v36  ;;  %1711 = vset.pattern.permute.xlu0 %v1799_v4  ;;  %v989_v36 = vld [vmem:[%s2532_s2 + $0x50] sm:$0xff] }
 0x292   : > { %1612 = vmatpush3.msra.mxu0 %v455_v38  ;;  %1008 = vmatpush1.msra.mxu1 %v994_v26 }
 0x293   : > { %1613 = vmatprep.subr.mxu0 %v470_v39  ;;  %1009 = vmatprep.subr.mxu1 %v1797_v62 }
 0x294   : > { %1614 = vmatpush3.msra.mxu0 %v454_v40  ;;  %1010 = vmatpush1.msra.mxu1 %v993_v27 }
 0x295   : > { %1615 = vmatprep.subr.mxu0 %v469_v41  ;;  %1011 = vmatprep.subr.mxu1 %v1797_v62  ;;  %v988_v41 = vld [vmem:[%s2532_s2 + $0x48] sm:$0xff] }
 0x296   : > { %1616 = vmatpush3.msra.mxu0 %v453_v42  ;;  %1012 = vmatpush1.msra.mxu1 %v992_v28 }
 0x297   : > { %1617 = vmatprep.subr.mxu0 %v468_v43  ;;  %1013 = vmatprep.subr.mxu1 %v1797_v62  ;;  %v987_v43 = vld [vmem:[%s2532_s2 + $0x40] sm:$0xff] }
 0x298   : > { %1618 = vmatpush3.msra.mxu0 %v452_v44  ;;  %1014 = vmatpush1.msra.mxu1 %v991_v29  ;;  %v1078_v44 = vld [vmem:[%s2534_s4] sm:$0x3] }
 0x299   : > { %698 = vmatmul.mubr.f32.vlgmr.msra.gmra.mxu0 %v1922_v2  ;;  %1630 = vmatprep.subr.mxu0 %v1797_v62  ;;  %v1332_v29 = vld [vmem:[%s2539_s9] sm:$0xf] }
 0x29a   : > { %1632 = vmatprep.mubr.msk.f32.mxu0 %vm1798_vm5, %v1797_v62  ;;  %1015 = vmatprep.subr.mxu1 %v1797_v62 }
 0x29b   : > { %1016 = vmatpush1.msra.mxu1 %v990_v32 }
 0x29c   : > { %1017 = vmatprep.subr.mxu1 %v1797_v62 }
 0x29d   : > { %1018 = vmatpush1.msra.mxu1 %v989_v36 }
 0x29e   : > { %1019 = vmatprep.subr.mxu1 %v1797_v62 }
 0x29f   : > { %1020 = vmatpush1.msra.mxu1 %v988_v41 }
 0x2a0   : > { %1021 = vmatprep.subr.mxu1 %v1797_v62 }
 0x2a1   : > { %1022 = vmatpush1.msra.mxu1 %v987_v43 }
 0x2a2   : > { %1023 = vmatprep.subr.mxu1 %v1797_v62 }
 0x2dd   : > { %v814_v45 = vpop.permute.xlu1 %813  ;;  %v811_v46 = vpop.permute.xlu0 %810 }
 0x2de   : > { %v816_v47 = vsel %vm752_vm4, %v811_v46, %v814_v45  ;;  %v986_v45 = vld [vmem:[%s2532_s2 + $0x38] sm:$0xff]  ;;  %v985_v46 = vld [vmem:[%s2532_s2 + $0x30] sm:$0xff] }
 0x2df   : > { %818 = vrot.lane.b32.xlu0 %v816_v47, %s2562_s16  ;;  %1024 = vmatpush1.msra.mxu1 %v986_v45  ;;  %v984_v47 = vld [vmem:[%s2532_s2 + $0x28] sm:$0xff] }
 0x2e0   : > { %1025 = vmatprep.subr.mxu1 %v1797_v62 }
 0x2e1   : > { %v940_v48 = vpop.permute.xlu1 %939  ;;  %v937_v49 = vpop.permute.xlu0 %936  ;;  %1026 = vmatpush1.msra.mxu1 %v985_v46 }
 0x2e2   : > { %v942_v50 = vsel %vm752_vm4, %v937_v49, %v940_v48  ;;  %1027 = vmatprep.subr.mxu1 %v1797_v62  ;;  %v983_v48 = vld [vmem:[%s2532_s2 + $0x20] sm:$0xff]  ;;  %v982_v49 = vld [vmem:[%s2532_s2 + $0x18] sm:$0xff] }
 0x2e3   : > { %944 = vrot.lane.b32.xlu1 %v942_v50, %s2562_s16  ;;  %1028 = vmatpush1.msra.mxu1 %v984_v47  ;;  %v981_v50 = vld [vmem:[%s2532_s2 + $0x10] sm:$0xff] }
 0x2e4   : > { %1029 = vmatprep.subr.mxu1 %v1797_v62 }
 0x2e5   : > { %1030 = vmatpush1.msra.mxu1 %v983_v48 }
 0x2e6   : > { %1031 = vmatprep.subr.mxu1 %v1797_v62 }
 0x2e7   : > { %1032 = vmatpush1.msra.mxu1 %v982_v49 }
 0x2e8   : > { %1033 = vmatprep.subr.mxu1 %v1797_v62 }
 0x2e9   : > { %v730_v51 = vpop.permute.xlu1 %729  ;;  %v727_v52 = vpop.permute.xlu0 %726  ;;  %1034 = vmatpush1.msra.mxu1 %v981_v50 }
 0x2ea   : > { %v733_v53 = vsel %vm732_vm1, %v727_v52, %v730_v51  ;;  %v980_v51 = vld [vmem:[%s2532_s2 + $0x8] sm:$0xff]  ;;  %1035 = vmatprep.subr.mxu1 %v1797_v62  ;;  %v979_v52 = vld [vmem:[%s2532_s2] sm:$0xff] }
 0x2eb   : > { %v734_v54 = vmax.f32 %v2065_v23, %v733_v53  ;;  %1036 = vmatpush1.msra.mxu1 %v980_v51  ;;  %v1002_v53 = vld [vmem:[%s2532_s2 + $0xb8] sm:$0xff] }
 0x2ec   : > { %1037 = vmatprep.subr.mxu1 %v1797_v62 }
 0x2ed   : > { %v869_v2 = vpop.permute.xlu1 %868  ;;  %739 = vrot.lane.b32.xlu1 %v734_v54, %s2563_s12  ;;  %736 = vrot.lane.b32.xlu0 %v734_v54, %s2564_s15  ;;  %v866_v55 = vpop.permute.xlu0 %865  ;;  %s2567_s12 = smov 112   ;;  %s2568_s15 = smov 80  }
 0x2ee   : > { %v871_v56 = vsel %vm742_vm2, %v866_v55, %v869_v2  ;;  %1038 = vmatpush1.msra.mxu1 %v979_v52  ;;  %v1000_v2 = vld [vmem:[%s2532_s2 + $0xa8] sm:$0xff]  ;;  %v999_v55 = vld [vmem:[%s2532_s2 + $0xa0] sm:$0xff] }
 0x2ef   : > { %v872_v37 = vmax.f32 %v2094_v34, %v871_v56  ;;  %1055 = vmatprep.subr.mxu1 %v1797_v62 }
 0x2f0   : > { %1056 = vmatpush2.msra.mxu1 %v1002_v53 }
 0x2f1   : > { %877 = vrot.lane.b32.xlu1 %v872_v37, %s1795_s22  ;;  %874 = vrot.lane.b32.xlu0 %v872_v37, %s1796_s29 }
 0x2f2   : > { %1057 = vmatprep.subr.mxu1 %v1797_v62 }
 0x335   : > { %v1549_v34 = vpop.f32.mrf.mxu0 }
 0x337   : > { %v1550_v61 = vpop.f32.mrf.mxu0 }
 0x338   : > { %v1551_v1 = vadd.f32 %v1550_v61, %v1549_v34  ;;  %v996_v34 = vld [vmem:[%s2532_s2 + $0x88] sm:$0xff]  ;;  %v1333_v61 = vld [vmem:[%s2540_s10] sm:$0xf] }
 0x34e   : > { %v1584_v60 = vpop.f32.mrf.mxu1 }
 0x351   : > { %v819_v57 = vpop.permute.xlu0 %818 }
 0x352   : > { %v2313_v58 = vmax.f32 %v2012_v63, %v819_v57  ;;  %v1585_v63 = vpop.f32.mrf.mxu1 }
 0x353   : > { %v1586_v3 = vadd.f32 %v1585_v63, %v1584_v60  ;;  %v995_v60 = vld [vmem:[%s2532_s2 + $0x80] sm:$0xff] }
 0x354   : > { %826 = vrot.lane.b32.xlu1 %v2313_v58, %s2565_s13  ;;  %823 = vrot.lane.b32.xlu0 %v2313_v58, %s2566_s24  ;;  %v1164_v63 = vld [vmem:[%s2536_s6] sm:$0xf] }
 0x355   : > { %v945_v23 = vpop.permute.xlu1 %944  ;;  %v630_v11 = vadd.f32 %v1586_v3, %v1551_v1 }
 0x356   : > { %v2320_v59 = vmax.f32 %v2031_v7, %v945_v23  ;;  %v997_v23 = vld [vmem:[%s2532_s2 + $0x90] sm:$0xff] }
 0x358   : > { %952 = vrot.lane.b32.xlu1 %v2320_v59, %s2565_s13  ;;  %949 = vrot.lane.b32.xlu0 %v2320_v59, %s2566_s24 }
 0x359   : > { %v1619_v8 = vpop.f32.mrf.mxu0 }
 0x35b   : > { %v1620_v13 = vpop.f32.mrf.mxu0 }
 0x35c   : > { %v1621_v15 = vadd.f32 %v1620_v13, %v1619_v8 }
 0x35e   : > { %v700_v16 = vadd.f32 %v1621_v15, %v630_v11 }
 0x35f   : > { %v740_v0 = vpop.permute.xlu1 %739  ;;  %v737_v7 = vpop.permute.xlu0 %736 }
 0x360   : > { %v743_v5 = vsel %vm742_vm2, %v737_v7, %v740_v0  ;;  %v703_v17 = vmul.f32 0.020833334, %v700_v16 }
 0x361   : > { %v744_v6 = vmax.f32 %v734_v54, %v743_v5  ;;  %v1001_v54 = vld [vmem:[%s2532_s2 + $0xb0] sm:$0xff] }
 0x362   : > { %1631 = vmatpush3.msk.msra.mxu0 %vm1088_vm6, %v703_v17  ;;  %1058 = vmatpush2.msra.mxu1 %v1001_v54  ;;  %v1249_v17 = vld [vmem:[%s2538_s8] sm:$0x3] }
 0x363   : > { %v878_v9 = vpop.permute.xlu1 %877  ;;  %749 = vrot.lane.b32.xlu1 %v744_v6, %s1795_s22  ;;  %746 = vrot.lane.b32.xlu0 %v744_v6, %s1796_s29  ;;  %v875_v10 = vpop.permute.xlu0 %874 }
 0x364   : > { %v880_v12 = vsel %vm752_vm4, %v875_v10, %v878_v9  ;;  %1633 = vmatmul.mubr.msk.f32.vlgmr.msra.gmra.mxu0 %vm1084_vm7, %v1077_v18  ;;  %1635 = vmatprep.subr.mxu0 %v1797_v62  ;;  %v1163_v10 = vld [vmem:[%s2535_s5] sm:$0xf] }
 0x365   : > { %v881_v14 = vmax.f32 %v872_v37, %v880_v12  ;;  %1637 = vmatprep.mubr.msk.f32.mxu0 %vm1798_vm5, %v1797_v62  ;;  %1059 = vmatprep.subr.mxu1 %v1797_v62  ;;  %v998_v37 = vld [vmem:[%s2532_s2 + $0x98] sm:$0xff] }
 0x366   : > { %1060 = vmatpush2.msra.mxu1 %v1000_v2 }
 0x367   : > { %886 = vrot.lane.b32.xlu1 %v881_v14, %s1795_s22  ;;  %883 = vrot.lane.b32.xlu0 %v881_v14, %s1796_s29 }
 0x368   : > { %1061 = vmatprep.subr.mxu1 %v1797_v62 }
 0x369   : > { %1062 = vmatpush2.msra.mxu1 %v999_v55 }
 0x36a   : > { %1063 = vmatprep.subr.mxu1 %v1797_v62 }
 0x36b   : > { %1064 = vmatpush2.msra.mxu1 %v998_v37 }
 0x36c   : > { %1065 = vmatprep.subr.mxu1 %v1797_v62 }
 0x36d   : > { %1066 = vmatpush2.msra.mxu1 %v997_v23 }
 0x36e   : > { %1067 = vmatprep.subr.mxu1 %v1797_v62 }
 0x36f   : > { %1068 = vmatpush2.msra.mxu1 %v996_v34 }
 0x370   : > { %1069 = vmatprep.subr.mxu1 %v1797_v62 }
 0x371   : > { %1070 = vmatpush2.msra.mxu1 %v995_v60 }
 0x3c6   : > { %v827_v19 = vpop.permute.xlu1 %826  ;;  %v824_v20 = vpop.permute.xlu0 %823 }
 0x3c7   : > { %v829_v21 = vsel %vm752_vm4, %v824_v20, %v827_v19  ;;  %v1248_v20 = vld [vmem:[%s2537_s7] sm:$0x3] }
 0x3c8   : > { %831 = vrot.lane.b32.xlu0 %v829_v21, %s2562_s16 }
 0x3ca   : > { %v953_v22 = vpop.permute.xlu1 %952  ;;  %v950_v24 = vpop.permute.xlu0 %949 }
 0x3cb   : > { %v955_v25 = vsel %vm752_vm4, %v950_v24, %v953_v22 }
 0x3cc   : > { %957 = vrot.lane.b32.xlu1 %v955_v25, %s2562_s16  ;;  %s1425_s16 = scalar_lea.sflag [#allocation3], %s377_s30 }
 0x3d5   : > { %v750_v30 = vpop.permute.xlu1 %749  ;;  %v747_v31 = vpop.permute.xlu0 %746 }
 0x3d6   : > { %v753_v33 = vsel %vm752_vm4, %v747_v31, %v750_v30 }
 0x3d7   : > { %v2367_v35 = vmax.f32 %v744_v6, %v753_v33 }
 0x3d9   : > { %v887_v38 = vpop.permute.xlu1 %886  ;;  %759 = vrot.lane.b32.xlu1 %v2367_v35, %s1795_s22  ;;  %756 = vrot.lane.b32.xlu0 %v2367_v35, %s1796_s29  ;;  %v884_v39 = vpop.permute.xlu0 %883  ;;  %s1800_s22 = smov 96  }
 0x3da   : > { %v889_v40 = vsel %vm752_vm4, %v884_v39, %v887_v38 }
 0x3db   : > { %v890_v42 = vmax.f32 %v881_v14, %v889_v40 }
 0x3dd   : > { %966 = vrot.lane.b32.xlu1 %v890_v42, %s1800_s22 }
 0x3e1   : > { %1081 = vperm.xlu1 %1710, %v1078_v44  }
 0x3e5   : > { %1167 = vperm.xlu1 %1710, %v1164_v63  }
 0x3e9   : > { %1336 = vperm.xlu1 %1710, %v1333_v61  }
 0x424   : > { %v1158_v56 = vpop.f32.mrf.mxu0 }
 0x426   : > { %v1634_v57 = vpop.f32.mrf.mxu0 }
 0x43a   : > { %v832_v0 = vpop.permute.xlu0 %831 }
 0x43b   : > { %v834_v7 = vmax.f32 %v2313_v58, %v832_v0 }
 0x43d   : > { %962 = vrot.lane.b32.xlu0 %v834_v7, %s2567_s12  ;;  %s1501_s12 = sshll.u32 %s377_s30, 2 }
 0x43e   : > { %v958_v1 = vpop.permute.xlu1 %957  ;;  %s379_s13 = scalar_lea.vmem [#allocation2], %s1501_s12 }
 0x43f   : > { %v960_v3 = vmax.f32 %v2320_v59, %v958_v1  ;;  %s1438_s24 = sshll.u32 %s379_s13, 4  ;;  %s1439_s24 = int_to_ptr.vmem [resolvable:$true] %s1438_s24 }
 0x440   : > { %s1719_s25 = scalar_lea.vmem %s1439_s24, 64  ;;  %p1726_p0 = scmp.lt.s32.totalorder %s1439_s24, %s1724_s1 }
 0x441   : > { %970 = vrot.lane.b32.xlu0 %v960_v3, %s2568_s15  ;;  %s1514_s15 = sshll.u32 %s1883_s21, 6  ;;  %p1720_p11 = scmp.ne.s32.totalorder %s1439_s24, %s1719_s25 }
 0x442   : > { %s2495_s29 = scalar_lea.hbm %s2541_s11, %s1514_s15  ;;  %s1725_s21 = scalar_lea.vmem %s1724_s1, 128 }
 0x443   : > { %p1721_p12 = pnand %p1720_p11, %p1900_p5  ;;  %p1727_p1 = scmp.lt.s32.totalorder %s1725_s21, %s1719_s25 }
 0x445   : > { %1252 = vperm.xlu0 %1711, %v1249_v17   ;;  %p1722_p13 = pneg %p1721_p12  ;;  %p1728_p2 = por %p1727_p1, %p1726_p0 }
 0x447   : > { %p1729_p3 = pnand %p1728_p2, %p1722_p13 }
 0x44b   : > { %v760_v4 = vpop.permute.xlu1 %759  ;;  %v757_v58 = vpop.permute.xlu0 %756 }
 0x44c   : > { %v762_v59 = vsel %vm752_vm4, %v757_v58, %v760_v4 }
 0x44d   : > { %v763_v12 = vmax.f32 %v2367_v35, %v762_v59 }
 0x44f   : > { %v967_v5 = vpop.permute.xlu1 %966 }
 0x45c   : > { %v1082_v6 = vpop.permute.xlu1 %1081 }
 0x45d   : > { %v1159_v8 = vadd.f32 %v1158_v56, %v1082_v6 }
 0x45f   : > { %v1162_v9 = vmax.f32 %v1159_v8, 0.0 }
 0x460   : > { %v1168_v30 = vpop.permute.xlu1 %1167 }
 0x461   : > { %1636 = vmatpush3.msk.msra.mxu0 %vm1174_vm8, %v1162_v9 }
 0x462   : > { %1638 = vmatmul.mubr.msk.f32.vlgmr.msra.gmra.mxu0 %vm1170_vm9, %v1163_v10  ;;  %1640 = vmatprep.subr.mxu0 %v1797_v62 }
 0x463   : > { %1642 = vmatprep.mubr.msk.f32.mxu0 %vm1798_vm5, %v1797_v62 }
 0x464   : > { %v1337_v31 = vpop.permute.xlu1 %1336 }
 0x4af   : > { %v963_v11 = vpop.permute.xlu0 %962 }
 0x4b0   : > { %v974_v13 = vsel %vm973_vm10, %v763_v12, %v963_v11 }
 0x4b1   : > { %v976_v16 = vsel %vm975_vm13, %v974_v13, %v967_v5 }
 0x4b3   : > { %v971_v14 = vpop.permute.xlu0 %970 }
 0x4b4   : > { %v978_v15 = vsel %vm977_vm11, %v967_v5, %v971_v14 }
 0x4b5   : > { %1503 = vmatprep.mubr.msk.f32.mxu1 %vm1003_vm12, %v978_v15 }
 0x4b6   : > { %1072 = vmatmul.mubr.f32.vlgmr.msra.gmra.mxu1 %v976_v16 }
 0x4c0   : > { %v1253_v24 = vpop.permute.xlu0 %1252 }
 0x522   : > { %v1244_v18 = vpop.f32.mrf.mxu0 }
 0x523   : > { %v1245_v33 = vadd.f32 %v1244_v18, %v1168_v30 }
 0x524   : > { %v1639_v19 = vpop.f32.mrf.mxu0 }
 0x576   : > { %v1073_v21 = vpop.f32.mrf.mxu1 }
 0x577   : > { %1641 = vmatpush3.msk.msra.mxu0 %vm1088_vm6, %v1073_v21 }
 0x578   : > { %v1075_v22 = vpop.f32.mrf.mxu1  ;;  %1643 = vmatmul.mubr.msk.f32.vlgmr.msra.gmra.mxu0 %vm1084_vm7, %v1248_v20  ;;  %1645 = vmatprep.subr.mxu0 %v1797_v62 }
 0x579   : > { %1647 = vmatprep.mubr.msk.f32.mxu0 %vm1798_vm5, %v1797_v62 }
 0x638   : > { %v1327_v25 = vpop.f32.mrf.mxu0 }
 0x639   : > { %v1328_v26 = vadd.f32 %v1327_v25, %v1253_v24 }
 0x63a   : > { %v1644_v27 = vpop.f32.mrf.mxu0 }
 0x63b   : > { %v1331_v28 = vmax.f32 %v1328_v26, 0.0 }
 0x63d   : > { %1646 = vmatpush3.msk.msra.mxu0 %vm1174_vm8, %v1331_v28 }
 0x63e   : > { %1648 = vmatmul.mubr.msk.f32.vlgmr.msra.gmra.mxu0 %vm1170_vm9, %v1332_v29 }
 0x6fe   : > { %v1411_v32 = vpop.f32.mrf.mxu0 }
 0x6ff   : > { %v1412_v62 = vadd.f32 %v1411_v32, %v1337_v31 }
 0x700   : > { %v1649_v35 = vpop.f32.mrf.mxu0 }
 0x701   : > { %v1415_v36 = vadd.f32 %v1412_v62, %v1245_v33 }
 0x703   : > { %v1512_v38 = vmul.f32 -1.442695, %v1415_v36 }
 0x705   : > { %1715 = vpow2.f32 %v1512_v38 }
 0x712   : > { %v1716_v39 = vpop.eup %1715 }
 0x713   : > { %v1419_v40 = vadd.f32 1.0, %v1716_v39 }
 0x715   : > { %1717 = vrcp.f32 %v1419_v40 }
 0x722   : > { %v1718_v41 = vpop.eup %1717 }
 0x723   : > { %1423 = vst.msk [vmem:[%s379_s13] sm:$0xf] %vm1422_vm14, %v1718_v41 }
 0x724   : > { %1732 = shalt.err (!%p1729_p3)
}
 0x725   : > { %s1733_s12 = scalar_lea.hbm %s2495_s29, 64  ;;  %s1737_s13 = scalar_lea.hbm %s2541_s11, 128 }
 0x726   : > { %p1734_p4 = scmp.ne.s32.totalorder %s2495_s29, %s1733_s12  ;;  %p1738_p9 = scmp.lt.s32.totalorder %s2495_s29, %s2541_s11 }
 0x727   : > { %p1739_p10 = scmp.lt.s32.totalorder %s1737_s13, %s1733_s12 }
 0x728   : > { %p1735_p7 = pnand %p1734_p4, %p1900_p5 }
 0x729   : > { %p1740_p11 = por %p1739_p10, %p1738_p9 }
 0x72a   : > { %p1736_p8 = pneg %p1735_p7 }
 0x72c   : > { %p1741_p12 = pnand %p1740_p11, %p1736_p8 }
 0x72e   : > { %1744 = shalt.err (!%p1741_p12)
}
 0x72f   : > { %1651 = dma.vmem_to_hbm [thread:$0]  (%p1900_p5), %s1439_s24, 64, %s2495_s29, %s1425_s16  }
 0x730 PF: > { %p1657_p13 = scmp.ge.s32.totalorder %s1779_s20, 2  ;;  %s1450_s1 = sand.u32 1, %s1767_s17  }
 0x731   : > { %s1451_s25 = scalar_lea.sflag [#allocation3], %s1450_s1 }
 0x732   : > { %p1654_p0 = pnand %p1657_p13, %p1904_p6 }
 0x734   : > { %p1655_p1 = pneg %p1654_p0 }
 0x736   : > { %1762 = dma.done.wait (%p1655_p1), %s1451_s25, 64  }
 0x737   : > { %1764 = vsyncadd (%p1655_p1), %s1451_s25, 4294967232  ;;  %p21_p2 = scmp.ge.s32.totalorder %s1887_s23, 4   ;;  %s2569_s17 = smov %s1771_s18 }
 0x738   : > { %s2570_s18 = smov %s1775_s19  ;;  %s2571_s19 = smov %s1898_s26 }
 0x739   : > { %s2572_s20 = smov %s1887_s23  ;;  %23 = sbr.rel (!%p21_p2) target bundleno = 6 (0x6), region = 99 }
 0x73e   :  { %1456 = vsyncpa [#allocation3], 1 }
 0x73f   :  { %1458 = vsyncpa [#allocation3 + $0x1], 1 }

</bundles_post_ra>
